<compile_context>
chip_gen: v5e
topology: v5e:2x2
jax: 0.10.0
libtpu: 0.0.40
codegen_flags: <defaults>
</compile_context>

<pallas_src>
import jax
import jax.numpy as jnp
from jax.experimental import pallas as pl
from jax.experimental.pallas import tpu as pltpu  # noqa: F401 (kept for TPU-specific tweaks)

# ------------------------- small model hyper-params -------------------------
B = 2            # batch
S = 8            # sequence length
H = 32           # hidden size (stand-in for 768)
NH = 4           # attention heads
HD = H // NH     # head dim
F = 4 * H        # FFN intermediate size (== 4H, required by the packing below)
L = 2            # encoder layers
VOCAB = 64       # vocab size
FT = 1           # extra feature dim  ->  top Linear is (H + FT) -> 1
assert F == 4 * H, "vector-slab packing assumes the BERT convention F == 4*H"

LAYER_KEYS = ('wq', 'bq', 'wk', 'bk', 'wv', 'bv', 'wo', 'bo',
              'ln1_g', 'ln1_b', 'w1', 'c1', 'w2', 'c2', 'ln2_g', 'ln2_b')


# ------------------------------ shared math ---------------------------------
def _layernorm(x, gamma, beta, eps=1e-12):
    mu = jnp.mean(x, axis=-1, keepdims=True)
    var = jnp.mean((x - mu) ** 2, axis=-1, keepdims=True)
    return (x - mu) * jax.lax.rsqrt(var + eps) * gamma + beta


def _gelu(x):
    # TODO(synk): HF BERT default 'gelu' is the erf form; tanh approximation
    # is used here (and in the reference) for a safe Mosaic lowering.
    c = 0.7978845608028654  # sqrt(2/pi)
    return 0.5 * x * (1.0 + jnp.tanh(c * (x + 0.044715 * x * x * x)))


# ------------------------------ fused Pallas kernel --------------------------
def _fused_forward_kernel(x_ref, bias_ref, fts_ref,
                          wqkvo_ref, w1_ref, w2_ref, vecs_ref, consts_ref,
                          out_ref):
    """Whole forward pass in one invocation (no grid).

    x_ref:      (B*S, H)               embeddings (token + positional)
    bias_ref:   (NH*B*S, NH*B*S)       additive attention mask (block-diag + padding)
    fts_ref:    (B, FT)
    wqkvo_ref:  (L, H, 4H)             wq|wk|wv|wo packed along lanes
    w1_ref:     (L, H, F)
    w2_ref:     (L, F, H)
    vecs_ref:   (L, 8, F)              row0=[bq|bk|bv|bo], 1=ln1_g, 2=ln1_b,
                                       3=c1, 4=c2, 5=ln2_g, 6=ln2_b, 7=pad
    consts_ref: (4, F)                 row0=emb_ln_g, 1=emb_ln_b, 2=top_W, 3=top_b
    out_ref:    (B, 1)
    """
    consts = consts_ref[...]
    bias = bias_ref[...]
    BS = B * S
    scale = 1.0 / (HD ** 0.5)

    # embedding LayerNorm
    x = _layernorm(x_ref[...], consts[0:1, :H], consts[1:2, :H])          # (BS, H)

    for l in range(L):                                                    # static unroll
        wqkvo = wqkvo_ref[l]                                              # (H, 4H)
        vecs = vecs_ref[l]                                                # (8, F)

        # fused Q|K|V|O projection (the O columns of this product are discarded)
        qkv = jnp.dot(x, wqkvo, preferred_element_type=jnp.float32) + vecs[0:1, :4 * H]

        # head-major sublane stacking: (B*S, H) -> (NH*B*S, HD)
        q_stk = jnp.concatenate(
            [qkv[:, h * HD:(h + 1) * HD] for h in range(NH)], axis=0)     # (NH*BS, HD)
        kT_stk = jnp.concatenate(
            [qkv[:, H + h * HD:H + (h + 1) * HD].T for h in range(NH)], axis=1)  # (HD, NH*BS)
        v_stk = jnp.concatenate(
            [qkv[:, 2 * H + h * HD:2 * H + (h + 1) * HD] for h in range(NH)], axis=0)

        # one score matmul + one softmax + one context matmul for all batches/heads
        sc = jnp.dot(q_stk, kT_stk, preferred_element_type=jnp.float32) * scale + bias
        sc = sc - jnp.max(sc, axis=-1, keepdims=True)
        p = jnp.exp(sc)
        p = p * pl.reciprocal(jnp.sum(p, axis=-1, keepdims=True), approx=True)
        ctx_stk = jnp.dot(p, v_stk, preferred_element_type=jnp.float32)   # (NH*BS, HD)

        # un-stack heads back onto lanes: (NH*B*S, HD) -> (B*S, H)
        ctx = jnp.concatenate(
            [ctx_stk[h * BS:(h + 1) * BS, :] for h in range(NH)], axis=1)
        attn = (jnp.dot(ctx, wqkvo[:, 3 * H:], preferred_element_type=jnp.float32)
                + vecs[0:1, 3 * H:])

        x1 = _layernorm(x + attn, vecs[1:2, :H], vecs[2:3, :H])
        hmid = _gelu(jnp.dot(x1, w1_ref[l], preferred_element_type=jnp.float32)
                     + vecs[3:4, :])
        ffn = jnp.dot(hmid, w2_ref[l], preferred_element_type=jnp.float32) + vecs[4:5, :H]
        x = _layernorm(x1 + ffn, vecs[5:6, :H], vecs[6:7, :H])

    # top Linear on cat(CLS, fts)  — the analogue of nn.Linear(769, 1)
    cls = jnp.concatenate([x[b * S:b * S + 1, :] for b in range(B)], axis=0)   # (B, H)
    top_w = consts[2:3, :]
    logit = (jnp.sum(cls * top_w[:, :H], axis=-1, keepdims=True)
             + jnp.sum(fts_ref[...] * top_w[:, H:H + FT], axis=-1, keepdims=True)
             + consts[3:4, 0:1])                                               # (B, 1)
    out_ref[...] = logit


# ------------------------------ forward pass ----------------------------------
@jax.jit
def markdown_model_forward(ids, mask, fts, packed):
    # glue: embedding gather + positional embeddings, flattened to (B*S, H)
    x_emb = (packed['tok_emb'][ids] + packed['pos_emb'][None, :, :]).astype(jnp.float32)
    x_emb = x_emb.reshape(B * S, H)

    # additive attention bias for the head-major stacked layout:
    # row r = h*(B*S) + b*S + s ; attend only within the same (head, batch)
    # block and only to non-padded keys.
    R = NH * B * S
    r = jnp.arange(R)
    hh = r // (B * S)
    bb = (r // S) % B
    ss = r % S
    same_blk = (hh[:, None] == hh[None, :]) & (bb[:, None] == bb[None, :])
    key_ok = (mask.astype(jnp.float32)[bb, ss] > 0.5)
    bias = jnp.where(same_blk & key_ok[None, :], 0.0, -1e9).astype(jnp.float32)

    fts_f = fts.astype(jnp.float32).reshape(B, FT)

    out = pl.pallas_call(
        _fused_forward_kernel,
        out_shape=jax.ShapeDtypeStruct((B, 1), jnp.float32),
    )(x_emb, bias, fts_f,
      packed['w_qkvo'], packed['w1'], packed['w2'],
      packed['vecs'], packed['consts'])
    return out


# ------------------------------ parameters -----------------------------------
def init_params(key):
    ks = jax.random.split(key, 16)

    def rnd(k, shape):
        return (0.02 * jax.random.normal(k, shape)).astype(jnp.float32)

    return {
        'tok_emb': rnd(ks[0], (VOCAB, H)),
        'pos_emb': rnd(ks[1], (S, H)),
        'emb_ln_g': jnp.ones((1, H), jnp.float32),
        'emb_ln_b': jnp.zeros((1, H), jnp.float32),
        # per-layer weights stacked with a leading L axis
        'wq': rnd(ks[2], (L, H, H)), 'bq': rnd(ks[3], (L, 1, H)),
        'wk': rnd(ks[4], (L, H, H)), 'bk': rnd(ks[5], (L, 1, H)),
        'wv': rnd(ks[6], (L, H, H)), 'bv': rnd(ks[7], (L, 1, H)),
        'wo': rnd(ks[8], (L, H, H)), 'bo': rnd(ks[9], (L, 1, H)),
        'ln1_g': jnp.ones((L, 1, H), jnp.float32),
        'ln1_b': jnp.zeros((L, 1, H), jnp.float32),
        'w1': rnd(ks[10], (L, H, F)), 'c1': rnd(ks[11], (L, 1, F)),
        'w2': rnd(ks[12], (L, F, H)), 'c2': rnd(ks[13], (L, 1, H)),
        'ln2_g': jnp.ones((L, 1, H), jnp.float32),
        'ln2_b': jnp.zeros((L, 1, H), jnp.float32),
        # top Linear:  (H + FT) -> 1   (analogue of nn.Linear(769, 1))
        'top_wt': rnd(ks[14], (1, H + FT)),
        'top_b': rnd(ks[15], (1, 1)),
    }


def pack_params(p):
    """Pack the 24 raw tensors into the 5 lane-dense slabs the kernel uses."""
    w_qkvo = jnp.concatenate([p['wq'], p['wk'], p['wv'], p['wo']], axis=-1)   # (L, H, 4H)

    def pad_row(v):          # (L, 1, n) -> (L, 1, F)
        return jnp.pad(v, ((0, 0), (0, 0), (0, F - v.shape[-1])))

    row0 = jnp.concatenate([p['bq'], p['bk'], p['bv'], p['bo']], axis=-1)     # (L, 1, 4H)
    vecs = jnp.concatenate([
        row0,
        pad_row(p['ln1_g']), pad_row(p['ln1_b']),
        p['c1'],
        pad_row(p['c2']), pad_row(p['ln2_g']), pad_row(p['ln2_b']),
        jnp.zeros((L, 1, F), jnp.float32),
    ], axis=1)                                                                # (L, 8, F)

    def pad1(v):             # (1, n) -> (1, F)
        return jnp.pad(v, ((0, 0), (0, F - v.shape[-1])))

    consts = jnp.concatenate([pad1(p['emb_ln_g']), pad1(p['emb_ln_b']),
                              pad1(p['top_wt']), pad1(p['top_b'])], axis=0)   # (4, F)

    return {'tok_emb': p['tok_emb'], 'pos_emb': p['pos_emb'],
            'w_qkvo': w_qkvo, 'w1': p['w1'], 'w2': p['w2'],
            'vecs': vecs, 'consts': consts}


# ------------------------------ pure-JAX reference -----------------------------
def _reference_forward(ids, mask, fts, params):
    x_all = params['tok_emb'][ids] + params['pos_emb'][None, :, :]
    neg_all = ((1.0 - mask.astype(jnp.float32)) * (-1e9))[:, None, :]         # (B, 1, S)
    outs = []
    for b in range(B):
        x = _layernorm(x_all[b], params['emb_ln_g'], params['emb_ln_b'])
        for li in range(L):
            p = {k: params[k][li] for k in LAYER_KEYS}
            q = x @ p['wq'] + p['bq']
            k_ = x @ p['wk'] + p['bk']
            v = x @ p['wv'] + p['bv']
            scale = 1.0 / (HD ** 0.5)
            heads = []
            for h in range(NH):
                lo, hi = h * HD, (h + 1) * HD
                sc = (q[:, lo:hi] @ k_[:, lo:hi].T) * scale + neg_all[b]
                sc = sc - jnp.max(sc, axis=-1, keepdims=True)
                pr = jnp.exp(sc)
                pr = pr / jnp.sum(pr, axis=-1, keepdims=True)
                heads.append(pr @ v[:, lo:hi])
            ctx = jnp.concatenate(heads, axis=-1)
            attn = ctx @ p['wo'] + p['bo']
            x1 = _layernorm(x + attn, p['ln1_g'], p['ln1_b'])
            hmid = _gelu(x1 @ p['w1'] + p['c1'])
            x = _layernorm(x1 + hmid @ p['w2'] + p['c2'], p['ln2_g'], p['ln2_b'])
        feats = jnp.concatenate([x[0:1, :], fts[b:b + 1, :].astype(jnp.float32)], axis=1)
        outs.append(feats @ params['top_wt'].T + params['top_b'])
    return jnp.concatenate(outs, axis=0)                                       # (B, 1)


# ------------------------------------ main ------------------------------------
if __name__ == "__main__":
    key = jax.random.PRNGKey(0)
    kp, kid, kft = jax.random.split(key, 3)

    params = init_params(kp)
    packed = pack_params(params)

    ids = jax.random.randint(kid, (B, S), 0, VOCAB)
    mask = jnp.ones((B, S), jnp.int32).at[:, 6:].set(0)   # pad the last 2 tokens
    fts = jax.random.normal(kft, (B, FT)).astype(jnp.float32)

    out = markdown_model_forward(ids, mask, fts, packed)
    out = jax.block_until_ready(out)

    ref = _reference_forward(ids, mask, fts, params)
    assert out.shape == (B, 1), out.shape
    assert bool(jnp.all(jnp.isfinite(out)))
    assert jnp.allclose(out, ref, atol=1e-2, rtol=1e-2), (out, ref)

    print("KERNEL_OK")
</pallas_src>

<mosaic_0001>
module attributes {stable_mosaic.version = 11 : i64} {
  func.func @_fused_forward_kernel(%arg0: memref<16x32xf32, #tpu.memory_space<vmem>>, %arg1: memref<64x64xf32, #tpu.memory_space<vmem>>, %arg2: memref<2x1xf32, #tpu.memory_space<vmem>>, %arg3: memref<2x32x128xf32, #tpu.memory_space<vmem>>, %arg4: memref<2x32x128xf32, #tpu.memory_space<vmem>>, %arg5: memref<2x128x32xf32, #tpu.memory_space<vmem>>, %arg6: memref<2x8x128xf32, #tpu.memory_space<vmem>>, %arg7: memref<4x128xf32, #tpu.memory_space<vmem>>, %arg8: memref<2x1xf32, #tpu.memory_space<vmem>>) attributes {dimension_semantics = [], scalar_prefetch = 0 : i64, scratch_operands = 0 : i64, tpu.core_type = #tpu.core_type<tc>} {
    %c0 = arith.constant 0 : index
    %c0_0 = arith.constant 0 : index
    %0 = vector.load %arg7[%c0, %c0_0] : memref<4x128xf32, #tpu.memory_space<vmem>>, vector<4x128xf32>
    %c0_1 = arith.constant 0 : index
    %c0_2 = arith.constant 0 : index
    %1 = vector.load %arg1[%c0_1, %c0_2] : memref<64x64xf32, #tpu.memory_space<vmem>>, vector<64x64xf32>
    %c0_3 = arith.constant 0 : index
    %c0_4 = arith.constant 0 : index
    %2 = vector.load %arg0[%c0_3, %c0_4] : memref<16x32xf32, #tpu.memory_space<vmem>>, vector<16x32xf32>
    %3 = vector.extract_strided_slice %0 {offsets = [0, 0], sizes = [1, 32], strides = [1, 1]} : vector<4x128xf32> to vector<1x32xf32>
    %4 = vector.extract_strided_slice %0 {offsets = [1, 0], sizes = [1, 32], strides = [1, 1]} : vector<4x128xf32> to vector<1x32xf32>
    %cst = arith.constant dense<0.000000e+00> : vector<16xf32>
    %5 = vector.multi_reduction <add>, %2, %cst [1] : vector<16x32xf32> to vector<16xf32>
    %6 = vector.shape_cast %5 : vector<16xf32> to vector<16x1xf32>
    %cst_5 = arith.constant 3.200000e+01 : f32
    %7 = vector.broadcast %cst_5 : f32 to vector<16x1xf32>
    %8 = arith.divf %6, %7 : vector<16x1xf32>
    %9 = vector.broadcast %8 : vector<16x1xf32> to vector<16x32xf32>
    %10 = arith.subf %2, %9 : vector<16x32xf32>
    %11 = arith.mulf %10, %10 : vector<16x32xf32>
    %cst_6 = arith.constant dense<0.000000e+00> : vector<16xf32>
    %12 = vector.multi_reduction <add>, %11, %cst_6 [1] : vector<16x32xf32> to vector<16xf32>
    %13 = vector.shape_cast %12 : vector<16xf32> to vector<16x1xf32>
    %cst_7 = arith.constant 3.200000e+01 : f32
    %14 = vector.broadcast %cst_7 : f32 to vector<16x1xf32>
    %15 = arith.divf %13, %14 : vector<16x1xf32>
    %16 = vector.broadcast %8 : vector<16x1xf32> to vector<16x32xf32>
    %17 = arith.subf %2, %16 : vector<16x32xf32>
    %cst_8 = arith.constant 9.99999996E-13 : f32
    %18 = vector.broadcast %cst_8 : f32 to vector<16x1xf32>
    %19 = arith.addf %15, %18 : vector<16x1xf32>
    %20 = math.rsqrt %19 : vector<16x1xf32>
    %21 = vector.broadcast %20 : vector<16x1xf32> to vector<16x32xf32>
    %22 = arith.mulf %17, %21 : vector<16x32xf32>
    %23 = vector.broadcast %3 : vector<1x32xf32> to vector<16x32xf32>
    %24 = arith.mulf %22, %23 : vector<16x32xf32>
    %25 = vector.broadcast %4 : vector<1x32xf32> to vector<16x32xf32>
    %26 = arith.addf %24, %25 : vector<16x32xf32>
    %c0_9 = arith.constant 0 : index
    %c0_10 = arith.constant 0 : index
    %c0_11 = arith.constant 0 : index
    %27 = vector.load %arg3[%c0_9, %c0_10, %c0_11] : memref<2x32x128xf32, #tpu.memory_space<vmem>>, vector<1x32x128xf32>
    %28 = vector.shape_cast %27 : vector<1x32x128xf32> to vector<32x128xf32>
    %c0_12 = arith.constant 0 : index
    %c0_13 = arith.constant 0 : index
    %c0_14 = arith.constant 0 : index
    %29 = vector.load %arg6[%c0_12, %c0_13, %c0_14] : memref<2x8x128xf32, #tpu.memory_space<vmem>>, vector<1x8x128xf32>
    %30 = vector.shape_cast %29 : vector<1x8x128xf32> to vector<8x128xf32>
    %cst_15 = arith.constant dense<0.000000e+00> : vector<16x128xf32>
    %31 = tpu.matmul %26, %28, %cst_15 {dimension_numbers = #tpu.dot_dimension_numbers<[1], [0], [0], [1], [0, 0, 1, 1], [], []>} : vector<16x32xf32>, vector<32x128xf32>, vector<16x128xf32> -> vector<16x128xf32>
    %32 = vector.extract_strided_slice %30 {offsets = [0, 0], sizes = [1, 128], strides = [1, 1]} : vector<8x128xf32> to vector<1x128xf32>
    %33 = vector.broadcast %32 : vector<1x128xf32> to vector<16x128xf32>
    %34 = arith.addf %31, %33 : vector<16x128xf32>
    %35 = vector.extract_strided_slice %34 {offsets = [0, 0], sizes = [16, 8], strides = [1, 1]} : vector<16x128xf32> to vector<16x8xf32>
    %36 = vector.extract_strided_slice %34 {offsets = [0, 8], sizes = [16, 8], strides = [1, 1]} : vector<16x128xf32> to vector<16x8xf32>
    %37 = vector.extract_strided_slice %34 {offsets = [0, 16], sizes = [16, 8], strides = [1, 1]} : vector<16x128xf32> to vector<16x8xf32>
    %38 = vector.extract_strided_slice %34 {offsets = [0, 24], sizes = [16, 8], strides = [1, 1]} : vector<16x128xf32> to vector<16x8xf32>
    %39 = tpu.concatenate %35, %36, %37, %38 in 0 : vector<16x8xf32>, vector<16x8xf32>, vector<16x8xf32>, vector<16x8xf32> -> vector<64x8xf32>
    %40 = vector.extract_strided_slice %34 {offsets = [0, 32], sizes = [16, 8], strides = [1, 1]} : vector<16x128xf32> to vector<16x8xf32>
    %41 = tpu.transpose %40, [1, 0] : vector<16x8xf32> -> vector<8x16xf32>
    %42 = vector.extract_strided_slice %34 {offsets = [0, 40], sizes = [16, 8], strides = [1, 1]} : vector<16x128xf32> to vector<16x8xf32>
    %43 = tpu.transpose %42, [1, 0] : vector<16x8xf32> -> vector<8x16xf32>
    %44 = vector.extract_strided_slice %34 {offsets = [0, 48], sizes = [16, 8], strides = [1, 1]} : vector<16x128xf32> to vector<16x8xf32>
    %45 = tpu.transpose %44, [1, 0] : vector<16x8xf32> -> vector<8x16xf32>
    %46 = vector.extract_strided_slice %34 {offsets = [0, 56], sizes = [16, 8], strides = [1, 1]} : vector<16x128xf32> to vector<16x8xf32>
    %47 = tpu.transpose %46, [1, 0] : vector<16x8xf32> -> vector<8x16xf32>
    %48 = tpu.concatenate %41, %43, %45, %47 in 1 : vector<8x16xf32>, vector<8x16xf32>, vector<8x16xf32>, vector<8x16xf32> -> vector<8x64xf32>
    %49 = vector.extract_strided_slice %34 {offsets = [0, 64], sizes = [16, 8], strides = [1, 1]} : vector<16x128xf32> to vector<16x8xf32>
    %50 = vector.extract_strided_slice %34 {offsets = [0, 72], sizes = [16, 8], strides = [1, 1]} : vector<16x128xf32> to vector<16x8xf32>
    %51 = vector.extract_strided_slice %34 {offsets = [0, 80], sizes = [16, 8], strides = [1, 1]} : vector<16x128xf32> to vector<16x8xf32>
    %52 = vector.extract_strided_slice %34 {offsets = [0, 88], sizes = [16, 8], strides = [1, 1]} : vector<16x128xf32> to vector<16x8xf32>
    %53 = tpu.concatenate %49, %50, %51, %52 in 0 : vector<16x8xf32>, vector<16x8xf32>, vector<16x8xf32>, vector<16x8xf32> -> vector<64x8xf32>
    %cst_16 = arith.constant dense<0.000000e+00> : vector<64x64xf32>
    %54 = tpu.matmul %39, %48, %cst_16 {dimension_numbers = #tpu.dot_dimension_numbers<[1], [0], [0], [1], [0, 0, 1, 1], [], []>} : vector<64x8xf32>, vector<8x64xf32>, vector<64x64xf32> -> vector<64x64xf32>
    %cst_17 = arith.constant 0.353553385 : f32
    %55 = vector.broadcast %cst_17 : f32 to vector<64x64xf32>
    %56 = arith.mulf %54, %55 : vector<64x64xf32>
    %57 = arith.addf %56, %1 : vector<64x64xf32>
    %cst_18 = arith.constant dense<0xFF800000> : vector<64xf32>
    %58 = vector.multi_reduction <maximumf>, %57, %cst_18 [1] : vector<64x64xf32> to vector<64xf32>
    %59 = vector.shape_cast %58 : vector<64xf32> to vector<64x1xf32>
    %60 = vector.broadcast %59 : vector<64x1xf32> to vector<64x64xf32>
    %61 = arith.subf %57, %60 : vector<64x64xf32>
    %62 = math.exp %61 : vector<64x64xf32>
    %cst_19 = arith.constant dense<0.000000e+00> : vector<64xf32>
    %63 = vector.multi_reduction <add>, %62, %cst_19 [1] : vector<64x64xf32> to vector<64xf32>
    %64 = vector.shape_cast %63 : vector<64xf32> to vector<64x1xf32>
    %65 = tpu.reciprocal %64 {approx = true} : vector<64x1xf32> -> vector<64x1xf32>
    %66 = vector.broadcast %65 : vector<64x1xf32> to vector<64x64xf32>
    %67 = arith.mulf %62, %66 : vector<64x64xf32>
    %cst_20 = arith.constant dense<0.000000e+00> : vector<64x8xf32>
    %68 = tpu.matmul %67, %53, %cst_20 {dimension_numbers = #tpu.dot_dimension_numbers<[1], [0], [0], [1], [0, 0, 1, 1], [], []>} : vector<64x64xf32>, vector<64x8xf32>, vector<64x8xf32> -> vector<64x8xf32>
    %69 = vector.extract_strided_slice %68 {offsets = [0, 0], sizes = [16, 8], strides = [1, 1]} : vector<64x8xf32> to vector<16x8xf32>
    %70 = vector.extract_strided_slice %68 {offsets = [16, 0], sizes = [16, 8], strides = [1, 1]} : vector<64x8xf32> to vector<16x8xf32>
    %71 = vector.extract_strided_slice %68 {offsets = [32, 0], sizes = [16, 8], strides = [1, 1]} : vector<64x8xf32> to vector<16x8xf32>
    %72 = vector.extract_strided_slice %68 {offsets = [48, 0], sizes = [16, 8], strides = [1, 1]} : vector<64x8xf32> to vector<16x8xf32>
    %73 = tpu.concatenate %69, %70, %71, %72 in 1 : vector<16x8xf32>, vector<16x8xf32>, vector<16x8xf32>, vector<16x8xf32> -> vector<16x32xf32>
    %74 = vector.extract_strided_slice %28 {offsets = [0, 96], sizes = [32, 32], strides = [1, 1]} : vector<32x128xf32> to vector<32x32xf32>
    %cst_21 = arith.constant dense<0.000000e+00> : vector<16x32xf32>
    %75 = tpu.matmul %73, %74, %cst_21 {dimension_numbers = #tpu.dot_dimension_numbers<[1], [0], [0], [1], [0, 0, 1, 1], [], []>} : vector<16x32xf32>, vector<32x32xf32>, vector<16x32xf32> -> vector<16x32xf32>
    %76 = vector.extract_strided_slice %30 {offsets = [0, 96], sizes = [1, 32], strides = [1, 1]} : vector<8x128xf32> to vector<1x32xf32>
    %77 = vector.broadcast %76 : vector<1x32xf32> to vector<16x32xf32>
    %78 = arith.addf %75, %77 : vector<16x32xf32>
    %79 = arith.addf %26, %78 : vector<16x32xf32>
    %80 = vector.extract_strided_slice %30 {offsets = [1, 0], sizes = [1, 32], strides = [1, 1]} : vector<8x128xf32> to vector<1x32xf32>
    %81 = vector.extract_strided_slice %30 {offsets = [2, 0], sizes = [1, 32], strides = [1, 1]} : vector<8x128xf32> to vector<1x32xf32>
    %cst_22 = arith.constant dense<0.000000e+00> : vector<16xf32>
    %82 = vector.multi_reduction <add>, %79, %cst_22 [1] : vector<16x32xf32> to vector<16xf32>
    %83 = vector.shape_cast %82 : vector<16xf32> to vector<16x1xf32>
    %cst_23 = arith.constant 3.200000e+01 : f32
    %84 = vector.broadcast %cst_23 : f32 to vector<16x1xf32>
    %85 = arith.divf %83, %84 : vector<16x1xf32>
    %86 = vector.broadcast %85 : vector<16x1xf32> to vector<16x32xf32>
    %87 = arith.subf %79, %86 : vector<16x32xf32>
    %88 = arith.mulf %87, %87 : vector<16x32xf32>
    %cst_24 = arith.constant dense<0.000000e+00> : vector<16xf32>
    %89 = vector.multi_reduction <add>, %88, %cst_24 [1] : vector<16x32xf32> to vector<16xf32>
    %90 = vector.shape_cast %89 : vector<16xf32> to vector<16x1xf32>
    %cst_25 = arith.constant 3.200000e+01 : f32
    %91 = vector.broadcast %cst_25 : f32 to vector<16x1xf32>
    %92 = arith.divf %90, %91 : vector<16x1xf32>
    %93 = vector.broadcast %85 : vector<16x1xf32> to vector<16x32xf32>
    %94 = arith.subf %79, %93 : vector<16x32xf32>
    %cst_26 = arith.constant 9.99999996E-13 : f32
    %95 = vector.broadcast %cst_26 : f32 to vector<16x1xf32>
    %96 = arith.addf %92, %95 : vector<16x1xf32>
    %97 = math.rsqrt %96 : vector<16x1xf32>
    %98 = vector.broadcast %97 : vector<16x1xf32> to vector<16x32xf32>
    %99 = arith.mulf %94, %98 : vector<16x32xf32>
    %100 = vector.broadcast %80 : vector<1x32xf32> to vector<16x32xf32>
    %101 = arith.mulf %99, %100 : vector<16x32xf32>
    %102 = vector.broadcast %81 : vector<1x32xf32> to vector<16x32xf32>
    %103 = arith.addf %101, %102 : vector<16x32xf32>
    %c0_27 = arith.constant 0 : index
    %c0_28 = arith.constant 0 : index
    %c0_29 = arith.constant 0 : index
    %104 = vector.load %arg4[%c0_27, %c0_28, %c0_29] : memref<2x32x128xf32, #tpu.memory_space<vmem>>, vector<1x32x128xf32>
    %105 = vector.shape_cast %104 : vector<1x32x128xf32> to vector<32x128xf32>
    %cst_30 = arith.constant dense<0.000000e+00> : vector<16x128xf32>
    %106 = tpu.matmul %103, %105, %cst_30 {dimension_numbers = #tpu.dot_dimension_numbers<[1], [0], [0], [1], [0, 0, 1, 1], [], []>} : vector<16x32xf32>, vector<32x128xf32>, vector<16x128xf32> -> vector<16x128xf32>
    %107 = vector.extract_strided_slice %30 {offsets = [3, 0], sizes = [1, 128], strides = [1, 1]} : vector<8x128xf32> to vector<1x128xf32>
    %108 = vector.broadcast %107 : vector<1x128xf32> to vector<16x128xf32>
    %109 = arith.addf %106, %108 : vector<16x128xf32>
    %cst_31 = arith.constant 5.000000e-01 : f32
    %110 = vector.broadcast %cst_31 : f32 to vector<16x128xf32>
    %111 = arith.mulf %110, %109 : vector<16x128xf32>
    %cst_32 = arith.constant 4.471500e-02 : f32
    %112 = vector.broadcast %cst_32 : f32 to vector<16x128xf32>
    %113 = arith.mulf %112, %109 : vector<16x128xf32>
    %114 = arith.mulf %113, %109 : vector<16x128xf32>
    %115 = arith.mulf %114, %109 : vector<16x128xf32>
    %116 = arith.addf %109, %115 : vector<16x128xf32>
    %cst_33 = arith.constant 0.797884583 : f32
    %117 = vector.broadcast %cst_33 : f32 to vector<16x128xf32>
    %118 = arith.mulf %117, %116 : vector<16x128xf32>
    %119 = math.tanh %118 : vector<16x128xf32>
    %cst_34 = arith.constant 1.000000e+00 : f32
    %120 = vector.broadcast %cst_34 : f32 to vector<16x128xf32>
    %121 = arith.addf %120, %119 : vector<16x128xf32>
    %122 = arith.mulf %111, %121 : vector<16x128xf32>
    %c0_35 = arith.constant 0 : index
    %c0_36 = arith.constant 0 : index
    %c0_37 = arith.constant 0 : index
    %123 = vector.load %arg5[%c0_35, %c0_36, %c0_37] : memref<2x128x32xf32, #tpu.memory_space<vmem>>, vector<1x128x32xf32>
    %124 = vector.shape_cast %123 : vector<1x128x32xf32> to vector<128x32xf32>
    %cst_38 = arith.constant dense<0.000000e+00> : vector<16x32xf32>
    %125 = tpu.matmul %122, %124, %cst_38 {dimension_numbers = #tpu.dot_dimension_numbers<[1], [0], [0], [1], [0, 0, 1, 1], [], []>} : vector<16x128xf32>, vector<128x32xf32>, vector<16x32xf32> -> vector<16x32xf32>
    %126 = vector.extract_strided_slice %30 {offsets = [4, 0], sizes = [1, 32], strides = [1, 1]} : vector<8x128xf32> to vector<1x32xf32>
    %127 = vector.broadcast %126 : vector<1x32xf32> to vector<16x32xf32>
    %128 = arith.addf %125, %127 : vector<16x32xf32>
    %129 = arith.addf %103, %128 : vector<16x32xf32>
    %130 = vector.extract_strided_slice %30 {offsets = [5, 0], sizes = [1, 32], strides = [1, 1]} : vector<8x128xf32> to vector<1x32xf32>
    %131 = vector.extract_strided_slice %30 {offsets = [6, 0], sizes = [1, 32], strides = [1, 1]} : vector<8x128xf32> to vector<1x32xf32>
    %cst_39 = arith.constant dense<0.000000e+00> : vector<16xf32>
    %132 = vector.multi_reduction <add>, %129, %cst_39 [1] : vector<16x32xf32> to vector<16xf32>
    %133 = vector.shape_cast %132 : vector<16xf32> to vector<16x1xf32>
    %cst_40 = arith.constant 3.200000e+01 : f32
    %134 = vector.broadcast %cst_40 : f32 to vector<16x1xf32>
    %135 = arith.divf %133, %134 : vector<16x1xf32>
    %136 = vector.broadcast %135 : vector<16x1xf32> to vector<16x32xf32>
    %137 = arith.subf %129, %136 : vector<16x32xf32>
    %138 = arith.mulf %137, %137 : vector<16x32xf32>
    %cst_41 = arith.constant dense<0.000000e+00> : vector<16xf32>
    %139 = vector.multi_reduction <add>, %138, %cst_41 [1] : vector<16x32xf32> to vector<16xf32>
    %140 = vector.shape_cast %139 : vector<16xf32> to vector<16x1xf32>
    %cst_42 = arith.constant 3.200000e+01 : f32
    %141 = vector.broadcast %cst_42 : f32 to vector<16x1xf32>
    %142 = arith.divf %140, %141 : vector<16x1xf32>
    %143 = vector.broadcast %135 : vector<16x1xf32> to vector<16x32xf32>
    %144 = arith.subf %129, %143 : vector<16x32xf32>
    %cst_43 = arith.constant 9.99999996E-13 : f32
    %145 = vector.broadcast %cst_43 : f32 to vector<16x1xf32>
    %146 = arith.addf %142, %145 : vector<16x1xf32>
    %147 = math.rsqrt %146 : vector<16x1xf32>
    %148 = vector.broadcast %147 : vector<16x1xf32> to vector<16x32xf32>
    %149 = arith.mulf %144, %148 : vector<16x32xf32>
    %150 = vector.broadcast %130 : vector<1x32xf32> to vector<16x32xf32>
    %151 = arith.mulf %149, %150 : vector<16x32xf32>
    %152 = vector.broadcast %131 : vector<1x32xf32> to vector<16x32xf32>
    %153 = arith.addf %151, %152 : vector<16x32xf32>
    %c1 = arith.constant 1 : index
    %c0_44 = arith.constant 0 : index
    %c0_45 = arith.constant 0 : index
    %154 = vector.load %arg3[%c1, %c0_44, %c0_45] : memref<2x32x128xf32, #tpu.memory_space<vmem>>, vector<1x32x128xf32>
    %155 = vector.shape_cast %154 : vector<1x32x128xf32> to vector<32x128xf32>
    %c1_46 = arith.constant 1 : index
    %c0_47 = arith.constant 0 : index
    %c0_48 = arith.constant 0 : index
    %156 = vector.load %arg6[%c1_46, %c0_47, %c0_48] : memref<2x8x128xf32, #tpu.memory_space<vmem>>, vector<1x8x128xf32>
    %157 = vector.shape_cast %156 : vector<1x8x128xf32> to vector<8x128xf32>
    %cst_49 = arith.constant dense<0.000000e+00> : vector<16x128xf32>
    %158 = tpu.matmul %153, %155, %cst_49 {dimension_numbers = #tpu.dot_dimension_numbers<[1], [0], [0], [1], [0, 0, 1, 1], [], []>} : vector<16x32xf32>, vector<32x128xf32>, vector<16x128xf32> -> vector<16x128xf32>
    %159 = vector.extract_strided_slice %157 {offsets = [0, 0], sizes = [1, 128], strides = [1, 1]} : vector<8x128xf32> to vector<1x128xf32>
    %160 = vector.broadcast %159 : vector<1x128xf32> to vector<16x128xf32>
    %161 = arith.addf %158, %160 : vector<16x128xf32>
    %162 = vector.extract_strided_slice %161 {offsets = [0, 0], sizes = [16, 8], strides = [1, 1]} : vector<16x128xf32> to vector<16x8xf32>
    %163 = vector.extract_strided_slice %161 {offsets = [0, 8], sizes = [16, 8], strides = [1, 1]} : vector<16x128xf32> to vector<16x8xf32>
    %164 = vector.extract_strided_slice %161 {offsets = [0, 16], sizes = [16, 8], strides = [1, 1]} : vector<16x128xf32> to vector<16x8xf32>
    %165 = vector.extract_strided_slice %161 {offsets = [0, 24], sizes = [16, 8], strides = [1, 1]} : vector<16x128xf32> to vector<16x8xf32>
    %166 = tpu.concatenate %162, %163, %164, %165 in 0 : vector<16x8xf32>, vector<16x8xf32>, vector<16x8xf32>, vector<16x8xf32> -> vector<64x8xf32>
    %167 = vector.extract_strided_slice %161 {offsets = [0, 32], sizes = [16, 8], strides = [1, 1]} : vector<16x128xf32> to vector<16x8xf32>
    %168 = tpu.transpose %167, [1, 0] : vector<16x8xf32> -> vector<8x16xf32>
    %169 = vector.extract_strided_slice %161 {offsets = [0, 40], sizes = [16, 8], strides = [1, 1]} : vector<16x128xf32> to vector<16x8xf32>
    %170 = tpu.transpose %169, [1, 0] : vector<16x8xf32> -> vector<8x16xf32>
    %171 = vector.extract_strided_slice %161 {offsets = [0, 48], sizes = [16, 8], strides = [1, 1]} : vector<16x128xf32> to vector<16x8xf32>
    %172 = tpu.transpose %171, [1, 0] : vector<16x8xf32> -> vector<8x16xf32>
    %173 = vector.extract_strided_slice %161 {offsets = [0, 56], sizes = [16, 8], strides = [1, 1]} : vector<16x128xf32> to vector<16x8xf32>
    %174 = tpu.transpose %173, [1, 0] : vector<16x8xf32> -> vector<8x16xf32>
    %175 = tpu.concatenate %168, %170, %172, %174 in 1 : vector<8x16xf32>, vector<8x16xf32>, vector<8x16xf32>, vector<8x16xf32> -> vector<8x64xf32>
    %176 = vector.extract_strided_slice %161 {offsets = [0, 64], sizes = [16, 8], strides = [1, 1]} : vector<16x128xf32> to vector<16x8xf32>
    %177 = vector.extract_strided_slice %161 {offsets = [0, 72], sizes = [16, 8], strides = [1, 1]} : vector<16x128xf32> to vector<16x8xf32>
    %178 = vector.extract_strided_slice %161 {offsets = [0, 80], sizes = [16, 8], strides = [1, 1]} : vector<16x128xf32> to vector<16x8xf32>
    %179 = vector.extract_strided_slice %161 {offsets = [0, 88], sizes = [16, 8], strides = [1, 1]} : vector<16x128xf32> to vector<16x8xf32>
    %180 = tpu.concatenate %176, %177, %178, %179 in 0 : vector<16x8xf32>, vector<16x8xf32>, vector<16x8xf32>, vector<16x8xf32> -> vector<64x8xf32>
    %cst_50 = arith.constant dense<0.000000e+00> : vector<64x64xf32>
    %181 = tpu.matmul %166, %175, %cst_50 {dimension_numbers = #tpu.dot_dimension_numbers<[1], [0], [0], [1], [0, 0, 1, 1], [], []>} : vector<64x8xf32>, vector<8x64xf32>, vector<64x64xf32> -> vector<64x64xf32>
    %cst_51 = arith.constant 0.353553385 : f32
    %182 = vector.broadcast %cst_51 : f32 to vector<64x64xf32>
    %183 = arith.mulf %181, %182 : vector<64x64xf32>
    %184 = arith.addf %183, %1 : vector<64x64xf32>
    %cst_52 = arith.constant dense<0xFF800000> : vector<64xf32>
    %185 = vector.multi_reduction <maximumf>, %184, %cst_52 [1] : vector<64x64xf32> to vector<64xf32>
    %186 = vector.shape_cast %185 : vector<64xf32> to vector<64x1xf32>
    %187 = vector.broadcast %186 : vector<64x1xf32> to vector<64x64xf32>
    %188 = arith.subf %184, %187 : vector<64x64xf32>
    %189 = math.exp %188 : vector<64x64xf32>
    %cst_53 = arith.constant dense<0.000000e+00> : vector<64xf32>
    %190 = vector.multi_reduction <add>, %189, %cst_53 [1] : vector<64x64xf32> to vector<64xf32>
    %191 = vector.shape_cast %190 : vector<64xf32> to vector<64x1xf32>
    %192 = tpu.reciprocal %191 {approx = true} : vector<64x1xf32> -> vector<64x1xf32>
    %193 = vector.broadcast %192 : vector<64x1xf32> to vector<64x64xf32>
    %194 = arith.mulf %189, %193 : vector<64x64xf32>
    %cst_54 = arith.constant dense<0.000000e+00> : vector<64x8xf32>
    %195 = tpu.matmul %194, %180, %cst_54 {dimension_numbers = #tpu.dot_dimension_numbers<[1], [0], [0], [1], [0, 0, 1, 1], [], []>} : vector<64x64xf32>, vector<64x8xf32>, vector<64x8xf32> -> vector<64x8xf32>
    %196 = vector.extract_strided_slice %195 {offsets = [0, 0], sizes = [16, 8], strides = [1, 1]} : vector<64x8xf32> to vector<16x8xf32>
    %197 = vector.extract_strided_slice %195 {offsets = [16, 0], sizes = [16, 8], strides = [1, 1]} : vector<64x8xf32> to vector<16x8xf32>
    %198 = vector.extract_strided_slice %195 {offsets = [32, 0], sizes = [16, 8], strides = [1, 1]} : vector<64x8xf32> to vector<16x8xf32>
    %199 = vector.extract_strided_slice %195 {offsets = [48, 0], sizes = [16, 8], strides = [1, 1]} : vector<64x8xf32> to vector<16x8xf32>
    %200 = tpu.concatenate %196, %197, %198, %199 in 1 : vector<16x8xf32>, vector<16x8xf32>, vector<16x8xf32>, vector<16x8xf32> -> vector<16x32xf32>
    %201 = vector.extract_strided_slice %155 {offsets = [0, 96], sizes = [32, 32], strides = [1, 1]} : vector<32x128xf32> to vector<32x32xf32>
    %cst_55 = arith.constant dense<0.000000e+00> : vector<16x32xf32>
    %202 = tpu.matmul %200, %201, %cst_55 {dimension_numbers = #tpu.dot_dimension_numbers<[1], [0], [0], [1], [0, 0, 1, 1], [], []>} : vector<16x32xf32>, vector<32x32xf32>, vector<16x32xf32> -> vector<16x32xf32>
    %203 = vector.extract_strided_slice %157 {offsets = [0, 96], sizes = [1, 32], strides = [1, 1]} : vector<8x128xf32> to vector<1x32xf32>
    %204 = vector.broadcast %203 : vector<1x32xf32> to vector<16x32xf32>
    %205 = arith.addf %202, %204 : vector<16x32xf32>
    %206 = arith.addf %153, %205 : vector<16x32xf32>
    %207 = vector.extract_strided_slice %157 {offsets = [1, 0], sizes = [1, 32], strides = [1, 1]} : vector<8x128xf32> to vector<1x32xf32>
    %208 = vector.extract_strided_slice %157 {offsets = [2, 0], sizes = [1, 32], strides = [1, 1]} : vector<8x128xf32> to vector<1x32xf32>
    %cst_56 = arith.constant dense<0.000000e+00> : vector<16xf32>
    %209 = vector.multi_reduction <add>, %206, %cst_56 [1] : vector<16x32xf32> to vector<16xf32>
    %210 = vector.shape_cast %209 : vector<16xf32> to vector<16x1xf32>
    %cst_57 = arith.constant 3.200000e+01 : f32
    %211 = vector.broadcast %cst_57 : f32 to vector<16x1xf32>
    %212 = arith.divf %210, %211 : vector<16x1xf32>
    %213 = vector.broadcast %212 : vector<16x1xf32> to vector<16x32xf32>
    %214 = arith.subf %206, %213 : vector<16x32xf32>
    %215 = arith.mulf %214, %214 : vector<16x32xf32>
    %cst_58 = arith.constant dense<0.000000e+00> : vector<16xf32>
    %216 = vector.multi_reduction <add>, %215, %cst_58 [1] : vector<16x32xf32> to vector<16xf32>
    %217 = vector.shape_cast %216 : vector<16xf32> to vector<16x1xf32>
    %cst_59 = arith.constant 3.200000e+01 : f32
    %218 = vector.broadcast %cst_59 : f32 to vector<16x1xf32>
    %219 = arith.divf %217, %218 : vector<16x1xf32>
    %220 = vector.broadcast %212 : vector<16x1xf32> to vector<16x32xf32>
    %221 = arith.subf %206, %220 : vector<16x32xf32>
    %cst_60 = arith.constant 9.99999996E-13 : f32
    %222 = vector.broadcast %cst_60 : f32 to vector<16x1xf32>
    %223 = arith.addf %219, %222 : vector<16x1xf32>
    %224 = math.rsqrt %223 : vector<16x1xf32>
    %225 = vector.broadcast %224 : vector<16x1xf32> to vector<16x32xf32>
    %226 = arith.mulf %221, %225 : vector<16x32xf32>
    %227 = vector.broadcast %207 : vector<1x32xf32> to vector<16x32xf32>
    %228 = arith.mulf %226, %227 : vector<16x32xf32>
    %229 = vector.broadcast %208 : vector<1x32xf32> to vector<16x32xf32>
    %230 = arith.addf %228, %229 : vector<16x32xf32>
    %c1_61 = arith.constant 1 : index
    %c0_62 = arith.constant 0 : index
    %c0_63 = arith.constant 0 : index
    %231 = vector.load %arg4[%c1_61, %c0_62, %c0_63] : memref<2x32x128xf32, #tpu.memory_space<vmem>>, vector<1x32x128xf32>
    %232 = vector.shape_cast %231 : vector<1x32x128xf32> to vector<32x128xf32>
    %cst_64 = arith.constant dense<0.000000e+00> : vector<16x128xf32>
    %233 = tpu.matmul %230, %232, %cst_64 {dimension_numbers = #tpu.dot_dimension_numbers<[1], [0], [0], [1], [0, 0, 1, 1], [], []>} : vector<16x32xf32>, vector<32x128xf32>, vector<16x128xf32> -> vector<16x128xf32>
    %234 = vector.extract_strided_slice %157 {offsets = [3, 0], sizes = [1, 128], strides = [1, 1]} : vector<8x128xf32> to vector<1x128xf32>
    %235 = vector.broadcast %234 : vector<1x128xf32> to vector<16x128xf32>
    %236 = arith.addf %233, %235 : vector<16x128xf32>
    %cst_65 = arith.constant 5.000000e-01 : f32
    %237 = vector.broadcast %cst_65 : f32 to vector<16x128xf32>
    %238 = arith.mulf %237, %236 : vector<16x128xf32>
    %cst_66 = arith.constant 4.471500e-02 : f32
    %239 = vector.broadcast %cst_66 : f32 to vector<16x128xf32>
    %240 = arith.mulf %239, %236 : vector<16x128xf32>
    %241 = arith.mulf %240, %236 : vector<16x128xf32>
    %242 = arith.mulf %241, %236 : vector<16x128xf32>
    %243 = arith.addf %236, %242 : vector<16x128xf32>
    %cst_67 = arith.constant 0.797884583 : f32
    %244 = vector.broadcast %cst_67 : f32 to vector<16x128xf32>
    %245 = arith.mulf %244, %243 : vector<16x128xf32>
    %246 = math.tanh %245 : vector<16x128xf32>
    %cst_68 = arith.constant 1.000000e+00 : f32
    %247 = vector.broadcast %cst_68 : f32 to vector<16x128xf32>
    %248 = arith.addf %247, %246 : vector<16x128xf32>
    %249 = arith.mulf %238, %248 : vector<16x128xf32>
    %c1_69 = arith.constant 1 : index
    %c0_70 = arith.constant 0 : index
    %c0_71 = arith.constant 0 : index
    %250 = vector.load %arg5[%c1_69, %c0_70, %c0_71] : memref<2x128x32xf32, #tpu.memory_space<vmem>>, vector<1x128x32xf32>
    %251 = vector.shape_cast %250 : vector<1x128x32xf32> to vector<128x32xf32>
    %cst_72 = arith.constant dense<0.000000e+00> : vector<16x32xf32>
    %252 = tpu.matmul %249, %251, %cst_72 {dimension_numbers = #tpu.dot_dimension_numbers<[1], [0], [0], [1], [0, 0, 1, 1], [], []>} : vector<16x128xf32>, vector<128x32xf32>, vector<16x32xf32> -> vector<16x32xf32>
    %253 = vector.extract_strided_slice %157 {offsets = [4, 0], sizes = [1, 32], strides = [1, 1]} : vector<8x128xf32> to vector<1x32xf32>
    %254 = vector.broadcast %253 : vector<1x32xf32> to vector<16x32xf32>
    %255 = arith.addf %252, %254 : vector<16x32xf32>
    %256 = arith.addf %230, %255 : vector<16x32xf32>
    %257 = vector.extract_strided_slice %157 {offsets = [5, 0], sizes = [1, 32], strides = [1, 1]} : vector<8x128xf32> to vector<1x32xf32>
    %258 = vector.extract_strided_slice %157 {offsets = [6, 0], sizes = [1, 32], strides = [1, 1]} : vector<8x128xf32> to vector<1x32xf32>
    %cst_73 = arith.constant dense<0.000000e+00> : vector<16xf32>
    %259 = vector.multi_reduction <add>, %256, %cst_73 [1] : vector<16x32xf32> to vector<16xf32>
    %260 = vector.shape_cast %259 : vector<16xf32> to vector<16x1xf32>
    %cst_74 = arith.constant 3.200000e+01 : f32
    %261 = vector.broadcast %cst_74 : f32 to vector<16x1xf32>
    %262 = arith.divf %260, %261 : vector<16x1xf32>
    %263 = vector.broadcast %262 : vector<16x1xf32> to vector<16x32xf32>
    %264 = arith.subf %256, %263 : vector<16x32xf32>
    %265 = arith.mulf %264, %264 : vector<16x32xf32>
    %cst_75 = arith.constant dense<0.000000e+00> : vector<16xf32>
    %266 = vector.multi_reduction <add>, %265, %cst_75 [1] : vector<16x32xf32> to vector<16xf32>
    %267 = vector.shape_cast %266 : vector<16xf32> to vector<16x1xf32>
    %cst_76 = arith.constant 3.200000e+01 : f32
    %268 = vector.broadcast %cst_76 : f32 to vector<16x1xf32>
    %269 = arith.divf %267, %268 : vector<16x1xf32>
    %270 = vector.broadcast %262 : vector<16x1xf32> to vector<16x32xf32>
    %271 = arith.subf %256, %270 : vector<16x32xf32>
    %cst_77 = arith.constant 9.99999996E-13 : f32
    %272 = vector.broadcast %cst_77 : f32 to vector<16x1xf32>
    %273 = arith.addf %269, %272 : vector<16x1xf32>
    %274 = math.rsqrt %273 : vector<16x1xf32>
    %275 = vector.broadcast %274 : vector<16x1xf32> to vector<16x32xf32>
    %276 = arith.mulf %271, %275 : vector<16x32xf32>
    %277 = vector.broadcast %257 : vector<1x32xf32> to vector<16x32xf32>
    %278 = arith.mulf %276, %277 : vector<16x32xf32>
    %279 = vector.broadcast %258 : vector<1x32xf32> to vector<16x32xf32>
    %280 = arith.addf %278, %279 : vector<16x32xf32>
    %281 = vector.extract_strided_slice %280 {offsets = [0, 0], sizes = [1, 32], strides = [1, 1]} : vector<16x32xf32> to vector<1x32xf32>
    %282 = vector.extract_strided_slice %280 {offsets = [8, 0], sizes = [1, 32], strides = [1, 1]} : vector<16x32xf32> to vector<1x32xf32>
    %283 = tpu.concatenate %281, %282 in 0 : vector<1x32xf32>, vector<1x32xf32> -> vector<2x32xf32>
    %284 = vector.extract_strided_slice %0 {offsets = [2, 0], sizes = [1, 128], strides = [1, 1]} : vector<4x128xf32> to vector<1x128xf32>
    %285 = vector.extract_strided_slice %284 {offsets = [0, 0], sizes = [1, 32], strides = [1, 1]} : vector<1x128xf32> to vector<1x32xf32>
    %286 = vector.broadcast %285 : vector<1x32xf32> to vector<2x32xf32>
    %287 = arith.mulf %283, %286 : vector<2x32xf32>
    %cst_78 = arith.constant dense<0.000000e+00> : vector<2xf32>
    %288 = vector.multi_reduction <add>, %287, %cst_78 [1] : vector<2x32xf32> to vector<2xf32>
    %289 = vector.shape_cast %288 : vector<2xf32> to vector<2x1xf32>
    %c0_79 = arith.constant 0 : index
    %c0_80 = arith.constant 0 : index
    %290 = vector.load %arg2[%c0_79, %c0_80] : memref<2x1xf32, #tpu.memory_space<vmem>>, vector<2x1xf32>
    %291 = vector.extract_strided_slice %284 {offsets = [0, 32], sizes = [1, 1], strides = [1, 1]} : vector<1x128xf32> to vector<1x1xf32>
    %292 = vector.broadcast %291 : vector<1x1xf32> to vector<2x1xf32>
    %293 = arith.mulf %290, %292 : vector<2x1xf32>
    %cst_81 = arith.constant dense<0.000000e+00> : vector<2xf32>
    %294 = vector.multi_reduction <add>, %293, %cst_81 [1] : vector<2x1xf32> to vector<2xf32>
    %295 = vector.shape_cast %294 : vector<2xf32> to vector<2x1xf32>
    %296 = arith.addf %289, %295 : vector<2x1xf32>
    %297 = vector.extract_strided_slice %0 {offsets = [3, 0], sizes = [1, 1], strides = [1, 1]} : vector<4x128xf32> to vector<1x1xf32>
    %298 = vector.broadcast %297 : vector<1x1xf32> to vector<2x1xf32>
    %299 = arith.addf %296, %298 : vector<2x1xf32>
    %c0_82 = arith.constant 0 : index
    %c0_83 = arith.constant 0 : index
    %300 = vector.load %arg8[%c0_82, %c0_83] : memref<2x1xf32, #tpu.memory_space<vmem>>, vector<2x1xf32>
    tpu.vector_store %arg8[%c0_82, %c0_83], %299 {strides = array<i32>} : memref<2x1xf32, #tpu.memory_space<vmem>>, vector<2x1xf32>,
    return
  }
}

</mosaic_0001>

<bundles_post_ra>
// kernel: markdown_model_forward.1
= control target key start
LH: loop header
LB: loop body
LE: loop exit
PB: predicated region body
PF: predicated region fallthrough
CT: control target
= control target key end

     0   :  { %vm40_vm0 = vcmask 261120   ;;  %v1940_v4 = vmov 32.0   ;;  %s1941_s20 = smov 96   ;;  %s1942_s21 = smov 72   ;;  %vm311_vm8 = vcmask 130048   ;;  %vm314_vm9 = vcmask 392192   ;;  %s2595_s0 = inlined_call_operand.vmem [shape: f32[16,32], index: 0, kind: input, shape index: {}]   ;;  %s2596_s3 = inlined_call_operand.vmem [shape: f32[2,32,128], index: 3, kind: input, shape index: {}]   ;;  %s2597_s7 = inlined_call_operand.vmem [shape: f32[4,128], index: 7, kind: input, shape index: {}]   ;;  %s2598_s6 = inlined_call_operand.vmem [shape: f32[2,8,128], index: 6, kind: input, shape index: {}]   ;;  %s2599_s1 = inlined_call_operand.vmem [shape: f32[64,64], index: 1, kind: input, shape index: {}]   ;;  %s2600_s4 = inlined_call_operand.vmem [shape: f32[2,32,128], index: 4, kind: input, shape index: {}]   ;;  %s2601_s5 = inlined_call_operand.vmem [shape: f32[2,128,32], index: 5, kind: input, shape index: {}]   ;;  %s2602_s2 = inlined_call_operand.vmem [shape: f32[2,1], index: 2, kind: input, shape index: {}]   ;;  %s2603_s8 = inlined_call_operand.vmem [shape: f32[2,1], index: 8, kind: output, shape index: {}]  }
   0x1   :  { %v38_v0 = vld [vmem:[%s2595_s0] sm:$0xff]  ;;  %v39_v2 = vld [vmem:[%s2595_s0 + $0x8] sm:$0xff]  ;;  %1844 = vrcp.f32 %v1940_v4  ;;  %v2016_v21 = vld [vmem:[%s2596_s3 + $0x18] sm:$0xff]  ;;  %s1943_s22 = smov 88   ;;  %s1944_s23 = smov 80   ;;  %vm316_vm10 = vcmask 64512  }
   0x2   :  { %v41_v1 = vsel %vm40_vm0, %v38_v0, 0.0  ;;  %v44_v3 = vsel %vm40_vm0, %v39_v2, 0.0  ;;  %122 = vmatpush.msra.mxu2 %v2016_v21  ;;  %v2022_v22 = vld [vmem:[%s2596_s3 + $0x10] sm:$0xff]  ;;  %v2028_v23 = vld [vmem:[%s2596_s3 + $0x8] sm:$0xff]  ;;  %v2034_v24 = vld [vmem:[%s2596_s3] sm:$0xff]  ;;  %s1945_s24 = smov 120  }
   0x3   :  { %42 = vadd.xlane.f32.xlu0 %v41_v1  ;;  %v1766_v25 = vpack.i.bf16 %v2022_v22, %v2016_v21  ;;  %v1771_v26 = vpack.i.bf16 %v2034_v24, %v2028_v23  ;;  %v29_v38 = vld [vmem:[%s2597_s7] sm:$0xf]  ;;  %s1946_s25 = smov 112   ;;  %s1947_s26 = smov 16   ;;  %vm390_vm11 = vcmask 523264   ;;  %vm596_vm12 = vcmask 195584  }
   0x4   :  { %123 = vmatpush.msra.mxu2 %v2022_v22  ;;  %v92_v42 = vperm.slane %v29_v38, 0  ;;  %v95_v46 = vperm.slane %v29_v38, 1  ;;  %v2057_v57 = vld [vmem:[%s2598_s6] sm:$0xff]  ;;  %s1948_s27 = smov 32   ;;  %s1949_s28 = smov 48  }
   0x5   :  { %v2060_v58 = vperm.slane %v2057_v57, 0  ;;  %s1950_s29 = smov 104   ;;  %s1951_s30 = smov 64  }
   0x6   :  { %124 = vmatpush.msra.mxu2 %v2028_v23  ;;  %s1952_s12 = smov 8   ;;  %s1953_s13 = smov 24  }
   0x7   :  { %v1845_v5 = vpop.eup %1844 }
   0x8   :  { %v48_v6 = vmul.f32 32.0, %v1845_v5  ;;  %vm52_vm1 = vweird.f32 %v1845_v5  ;;  %125 = vmatpush.msra.mxu2 %v2034_v24 }
   0xa   :  { %v49_v7 = vsub.f32 1.0, %v48_v6 }
   0xb   :  { %45 = vadd.xlane.f32.xlu0 %v44_v3 }
   0xc   :  { %v50_v8 = vmul.f32 %v1845_v5, %v49_v7 }
   0xe   :  { %v51_v9 = vadd.f32 %v1845_v5, %v50_v8 }
  0x10   :  { %v2007_v10 = vsel %vm52_vm1, %v1845_v5, %v51_v9 }
  0x76   :  { %v43_v11 = vpop.xlane.xlu0 %42 }
  0x77   :  { %v54_v12 = vmul.f32 %v2007_v10, %v43_v11 }
  0x79   :  { %v56_v13 = vsub.f32 %v38_v0, %v54_v12 }
  0x7b   :  { %v58_v14 = vmul.f32 %v56_v13, %v56_v13 }
  0x7d   :  { %v60_v15 = vsel %vm40_vm0, %v58_v14, 0.0 }
  0x7e   :  { %61 = vadd.xlane.f32.xlu1 %v60_v15  ;;  %v46_v16 = vpop.xlane.xlu0 %45 }
  0x7f   :  { %v55_v17 = vmul.f32 %v2007_v10, %v46_v16 }
  0x81   :  { %v57_v18 = vsub.f32 %v39_v2, %v55_v17 }
  0x83   :  { %v59_v19 = vmul.f32 %v57_v18, %v57_v18 }
  0x85   :  { %v63_v20 = vsel %vm40_vm0, %v59_v19, 0.0 }
  0x86   :  { %64 = vadd.xlane.f32.xlu1 %v63_v20 }
  0xf1   :  { %v62_v27 = vpop.xlane.xlu1 %61 }
  0xf2   :  { %v66_v28 = vmul.f32 %v62_v27, %v2007_v10 }
  0xf4   :  { %v68_v29 = vadd.f32 1e-12, %v66_v28 }
  0xf6   :  { %1846 = vrsqrt.f32 %v68_v29  ;;  %vm76_vm3 = vweird.f32 %v68_v29 }
  0xf9   :  { %v65_v30 = vpop.xlane.xlu1 %64 }
  0xfa   :  { %v67_v31 = vmul.f32 %v65_v30, %v2007_v10 }
  0xfc   :  { %v1847_v32 = vpop.eup %1846  ;;  %v69_v33 = vadd.f32 1e-12, %v67_v31 }
  0xfd   :  { %v71_v34 = vmul.f32 %v1847_v32, %v68_v29  ;;  %vm77_vm2 = vweird.f32 %v1847_v32 }
  0xfe   :  { %1848 = vrsqrt.f32 %v69_v33  ;;  %vm78_vm4 = vmor %vm76_vm3, %vm77_vm2  ;;  %vm86_vm6 = vweird.f32 %v69_v33 }
  0xff   :  { %v72_v35 = vmul.f32 %v1847_v32, %v71_v34 }
 0x101   :  { %v73_v36 = vmul.f32 0.5, %v72_v35 }
 0x103   :  { %v74_v37 = vsub.f32 1.5, %v73_v36 }
 0x104   :  { %v1849_v39 = vpop.eup %1848 }
 0x105   :  { %v75_v40 = vmul.f32 %v1847_v32, %v74_v37  ;;  %v81_v41 = vmul.f32 %v1849_v39, %v69_v33  ;;  %vm87_vm5 = vweird.f32 %v1849_v39 }
 0x106   :  { %vm88_vm7 = vmor %vm86_vm6, %vm87_vm5 }
 0x107   :  { %v82_v43 = vmul.f32 %v1849_v39, %v81_v41  ;;  %v79_v44 = vsel %vm78_vm4, %v1847_v32, %v75_v40 }
 0x108   :  { %v90_v45 = vmul.f32 %v79_v44, %v56_v13 }
 0x109   :  { %v83_v47 = vmul.f32 0.5, %v82_v43 }
 0x10a   :  { %v93_v48 = vmul.f32 %v92_v42, %v90_v45 }
 0x10b   :  { %v84_v49 = vsub.f32 1.5, %v83_v47  ;;  %v2119_v47 = vld [vmem:[%s2599_s1 + $0x8] sm:$0xff] }
 0x10c   :  { %v2046_v50 = vadd.f32 %v95_v46, %v93_v48 }
 0x10d   :  { %v85_v51 = vmul.f32 %v1849_v39, %v84_v49 }
 0x10e   :  { %1616 = vmatmul.msk.f32.vlgmr.msra.gmra.mxu2 %vm40_vm0, %v2046_v50 }
 0x10f   :  { %v89_v52 = vsel %vm88_vm7, %v1849_v39, %v85_v51 }
 0x110   :  { %v91_v53 = vmul.f32 %v89_v52, %v57_v18 }
 0x112   :  { %v94_v54 = vmul.f32 %v92_v42, %v91_v53  ;;  %v30_v42 = vld [vmem:[%s2599_s1] sm:$0xff]  ;;  %v2126_v53 = vld [vmem:[%s2599_s1 + $0x10] sm:$0xff] }
 0x114   :  { %v2050_v55 = vadd.f32 %v95_v46, %v94_v54 }
 0x116   :  { %1617 = vmatmul.msk.f32.gmra.mxu2 %vm40_vm0, %v2050_v55 }
 0x191   :  { %v127_v56 = vpop.f32.mrf.mxu2 }
 0x192   :  { %v2063_v60 = vadd.f32 %v127_v56, %v2060_v58 }
 0x199   :  { %v130_v59 = vpop.f32.mrf.mxu2 }
 0x19a   :  { %v2066_v61 = vadd.f32 %v130_v59, %v2060_v58 }
 0x19c   :  { %v1723_v62 = vpack.i.bf16 %v2066_v61, %v2063_v60 }
 0x19e   :  { %1724 = vrot.lane.b32.xlu1 %v1723_v62, %s1941_s20  ;;  %1719 = vrot.lane.b32.xlu0 %v1723_v62, %s1942_s21 }
 0x19f   :  { %1709 = vrot.lane.b32.xlu2 %v1723_v62, %s1943_s22 }
 0x1a7   :  { %1714 = vrot.lane.b32.xlu2 %v1723_v62, %s1944_s23 }
 0x1f9   :  { %v1710_v63 = vpop.permute.xlu2 %1709 }
 0x1fa   :  { %v1711_v1 = vunpack.i.l.bf16 %v1710_v63  ;;  %v1712_v5 = vunpack.i.h.bf16 %v1710_v63 }
 0x201   :  { %v1715_v0 = vpop.permute.xlu2 %1714 }
 0x202   :  { %v1716_v2 = vunpack.i.l.bf16 %v1715_v0  ;;  %v1717_v4 = vunpack.i.h.bf16 %v1715_v0 }
 0x204   :  { %v1728_v3 = vpack.i.bf16 %v1716_v2, %v1711_v1  ;;  %v1730_v6 = vpack.i.bf16 %v1717_v4, %v1712_v5  ;;  %v2133_v2 = vld [vmem:[%s2599_s1 + $0x18] sm:$0xff] }
 0x206   :  { %1729 = vxpose.xlu2.b32.start [1/2] (short) (narrow) %v1728_v3, 8 }
 0x20e   :  { %1731 = vxpose.xlu2.b32.end [2/2] (short) (narrow) %v1730_v6, 8 }
 0x210   :  { %v1725_v7 = vpop.permute.xlu1 %1724  ;;  %v1720_v8 = vpop.permute.xlu0 %1719 }
 0x211   :  { %v1726_v9 = vunpack.i.l.bf16 %v1725_v7  ;;  %v1721_v11 = vunpack.i.l.bf16 %v1720_v8  ;;  %v1727_v13 = vunpack.i.h.bf16 %v1725_v7  ;;  %v1722_v14 = vunpack.i.h.bf16 %v1720_v8  ;;  %v2140_v7 = vld [vmem:[%s2599_s1 + $0x20] sm:$0xff] }
 0x213   :  { %v1737_v12 = vpack.i.bf16 %v1726_v9, %v1721_v11  ;;  %v1739_v15 = vpack.i.bf16 %v1727_v13, %v1722_v14  ;;  %v2147_v13 = vld [vmem:[%s2599_s1 + $0x28] sm:$0xff] }
 0x215   :  { %1738 = vxpose.xlu0.b32.start [1/2] (short) (narrow) %v1737_v12, 8 }
 0x21d   :  { %1740 = vxpose.xlu0.b32.end [2/2] (short) (narrow) %v1739_v15, 8 }
 0x277   :  { %135 = vrot.lane.b32.xlu2 %v2063_v60, %s1945_s24 }
 0x28b   :  { %141 = vrot.lane.b32.xlu0 %v2066_v61, %s1946_s25 }
 0x29f   :  { %v1732_v16 = vpop.trf.xlu2 }
 0x2a0   :  { %v1733_v17 = vunpack.i.l.bf16 %v1732_v16  ;;  %v1736_v18 = vunpack.i.h.bf16 %v1732_v16 }
 0x2a2   :  { %300 = vrot.lane.b32.xlu1 %v1733_v17, %s1947_s26 }
 0x2aa   :  { %304 = vrot.lane.b32.xlu1 %v1736_v18, %s1948_s27  ;;  %v2154_v18 = vld [vmem:[%s2599_s1 + $0x30] sm:$0xff] }
 0x2b9   :  { %v1741_v19 = vpop.trf.xlu0 }
 0x2ba   :  { %v1742_v20 = vunpack.i.l.bf16 %v1741_v19  ;;  %v1745_v29 = vunpack.i.h.bf16 %v1741_v19 }
 0x2bc   :  { %308 = vrot.lane.b32.xlu1 %v1742_v20, %s1949_s28 }
 0x2c4   :  { %137 = vrot.lane.b32.xlu1 %v2066_v61, %s1945_s24 }
 0x2cc   :  { %139 = vrot.lane.b32.xlu1 %v2063_v60, %s1946_s25 }
 0x2d1   :  { %v2100_v36 = vpop.permute.xlu2 %135 }
 0x2d4   :  { %143 = vrot.lane.b32.xlu1 %v2063_v60, %s1950_s29 }
 0x2dc   :  { %145 = vrot.lane.b32.xlu1 %v2066_v61, %s1950_s29 }
 0x2fd   :  { %v142_v40 = vpop.permute.xlu0 %141 }
 0x314   :  { %v301_v27 = vpop.permute.xlu1 %300 }
 0x315   :  { %v312_v30 = vsel %vm311_vm8, %v1745_v29, %v301_v27  ;;  %v2161_v29 = vld [vmem:[%s2599_s1 + $0x38] sm:$0xff] }
 0x31c   :  { %v305_v28 = vpop.permute.xlu1 %304 }
 0x31d   :  { %v313_v31 = vsel %vm40_vm0, %v312_v30, %v305_v28 }
 0x32e   :  { %v309_v32 = vpop.permute.xlu1 %308 }
 0x32f   :  { %v315_v33 = vsel %vm314_vm9, %v313_v31, %v309_v32 }
 0x330   :  { %348 = vmatpush.msra.mxu1 %v315_v33 }
 0x331   :  { %1618 = vmatmul.msk.f32.vlgmr.msra.gmra.mxu1 %vm316_vm10, %v2063_v60 }
 0x336   :  { %v2094_v34 = vpop.permute.xlu1 %137 }
 0x339   :  { %1619 = vmatmul.msk.f32.gmra.mxu1 %vm316_vm10, %v2066_v61 }
 0x33e   :  { %v2098_v35 = vpop.permute.xlu1 %139 }
 0x33f   :  { %v1751_v32 = vpack.i.bf16 %v2098_v35, %v142_v40 }
 0x341   :  { %1620 = vmatmul.msk.f32.gmra.mxu1 %vm316_vm10, %v2100_v36 }
 0x346   :  { %v144_v37 = vpop.permute.xlu1 %143 }
 0x349   :  { %1621 = vmatmul.msk.f32.gmra.mxu1 %vm316_vm10, %v2094_v34 }
 0x34e   :  { %v146_v38 = vpop.permute.xlu1 %145 }
 0x34f   :  { %v1746_v39 = vpack.i.bf16 %v144_v37, %v146_v38 }
 0x351   :  { %1622 = vmatmul.msk.f32.gmra.mxu1 %vm316_vm10, %v2098_v35  ;;  %1747 = vrot.lane.b32.xlu1 %v1746_v39, %s1951_s30 }
 0x359   :  { %1623 = vmatmul.msk.f32.gmra.mxu1 %vm316_vm10, %v142_v40 }
 0x361   :  { %1624 = vmatmul.msk.f32.gmra.mxu1 %vm316_vm10, %v144_v37  ;;  %v1756_v37 = vpack.i.bf16 %v2100_v36, %v2094_v34 }
 0x369   :  { %1625 = vmatmul.msk.f32.gmra.mxu1 %vm316_vm10, %v146_v38  ;;  %v1761_v38 = vpack.i.bf16 %v2063_v60, %v2066_v61 }
 0x3ae   :  { %v350_v41 = vpop.f32.mrf.mxu1 }
 0x3af   :  { %v374_v43 = vmul.f32 0.35355338, %v350_v41 }
 0x3b1   :  { %v382_v44 = vadd.f32 %v374_v43, %v30_v42 }
 0x3b3   :  { %v391_v45 = vsel %vm390_vm11, %v382_v44, -inf }
 0x3b4   :  { %392 = vmax.xlane.f32.xlu1 %v391_v45 }
 0x3b6   :  { %v353_v46 = vpop.f32.mrf.mxu1 }
 0x3b7   :  { %v375_v48 = vmul.f32 0.35355338, %v353_v46 }
 0x3b9   :  { %v383_v49 = vadd.f32 %v375_v48, %v2119_v47 }
 0x3bb   :  { %v394_v51 = vsel %vm390_vm11, %v383_v49, -inf }
 0x3bc   :  { %395 = vmax.xlane.f32.xlu1 %v394_v51 }
 0x3be   :  { %v356_v52 = vpop.f32.mrf.mxu1 }
 0x3bf   :  { %v376_v54 = vmul.f32 0.35355338, %v356_v52 }
 0x3c1   :  { %v384_v56 = vadd.f32 %v376_v54, %v2126_v53 }
 0x3c3   :  { %v1748_v59 = vpop.permute.xlu1 %1747  ;;  %v397_v62 = vsel %vm390_vm11, %v384_v56, -inf }
 0x3c4   :  { %398 = vmax.xlane.f32.xlu1 %v397_v62  ;;  %v1749_v63 = vunpack.i.l.bf16 %v1748_v59  ;;  %v1750_v1 = vunpack.i.h.bf16 %v1748_v59 }
 0x3c6   :  { %v359_v0 = vpop.f32.mrf.mxu1  ;;  %535 = vmatpush.msrb.mxu2 %v1749_v63 }
 0x3c7   :  { %v377_v3 = vmul.f32 0.35355338, %v359_v0 }
 0x3c8   :  { %536 = vmatpush.msrb.mxu2 %v1750_v1 }
 0x3c9   :  { %v385_v4 = vadd.f32 %v377_v3, %v2133_v2 }
 0x3cb   :  { %v400_v5 = vsel %vm390_vm11, %v385_v4, -inf }
 0x3cc   :  { %401 = vmax.xlane.f32.xlu1 %v400_v5 }
 0x3ce   :  { %v362_v6 = vpop.f32.mrf.mxu1 }
 0x3cf   :  { %v378_v8 = vmul.f32 0.35355338, %v362_v6 }
 0x3d1   :  { %v386_v9 = vadd.f32 %v378_v8, %v2140_v7 }
 0x3d3   :  { %v403_v11 = vsel %vm390_vm11, %v386_v9, -inf }
 0x3d4   :  { %404 = vmax.xlane.f32.xlu1 %v403_v11 }
 0x3d6   :  { %v365_v12 = vpop.f32.mrf.mxu1 }
 0x3d7   :  { %v379_v14 = vmul.f32 0.35355338, %v365_v12 }
 0x3d9   :  { %v387_v15 = vadd.f32 %v379_v14, %v2147_v13 }
 0x3db   :  { %v406_v16 = vsel %vm390_vm11, %v387_v15, -inf }
 0x3dc   :  { %407 = vmax.xlane.f32.xlu2 %v406_v16 }
 0x3de   :  { %v368_v17 = vpop.f32.mrf.mxu1 }
 0x3df   :  { %v380_v19 = vmul.f32 0.35355338, %v368_v17 }
 0x3e1   :  { %v388_v20 = vadd.f32 %v380_v19, %v2154_v18 }
 0x3e3   :  { %v409_v27 = vsel %vm390_vm11, %v388_v20, -inf }
 0x3e4   :  { %410 = vmax.xlane.f32.xlu0 %v409_v27 }
 0x3e6   :  { %v371_v28 = vpop.f32.mrf.mxu1 }
 0x3e7   :  { %v381_v30 = vmul.f32 0.35355338, %v371_v28 }
 0x3e9   :  { %v389_v31 = vadd.f32 %v381_v30, %v2161_v29 }
 0x3eb   :  { %v412_v33 = vsel %vm390_vm11, %v389_v31, -inf }
 0x3ec   :  { %413 = vmax.xlane.f32.xlu0 %v412_v33 }
 0x3ed   :  { %1752 = vrot.lane.b32.xlu1 %v1751_v32, %s1951_s30 }
 0x3f4   :  { %1757 = vrot.lane.b32.xlu2 %v1756_v37, %s1951_s30 }
 0x3fc   :  { %1762 = vrot.lane.b32.xlu2 %v1761_v38, %s1951_s30 }
 0x427   :  { %v393_v39 = vpop.xlane.xlu1 %392 }
 0x428   :  { %v415_v41 = vsub.f32 %v382_v44, %v393_v39 }
 0x42a   :  { %v423_v42 = vmul.f32 1.442695, %v415_v41 }
 0x42c   :  { %1850 = vpow2.f32 %v423_v42 }
 0x42f   :  { %v396_v35 = vpop.xlane.xlu1 %395 }
 0x430   :  { %v416_v40 = vsub.f32 %v383_v49, %v396_v35 }
 0x432   :  { %v2173_v43 = vpop.eup %1850  ;;  %v425_v45 = vmul.f32 1.442695, %v416_v40 }
 0x433   :  { %v439_v46 = vsel %vm390_vm11, %v2173_v43, 0.0 }
 0x434   :  { %1852 = vpow2.f32 %v425_v45  ;;  %440 = vadd.xlane.f32.xlu1 %v439_v46 }
 0x437   :  { %v399_v34 = vpop.xlane.xlu1 %398 }
 0x438   :  { %v417_v36 = vsub.f32 %v384_v56, %v399_v34 }
 0x43a   :  { %v2177_v48 = vpop.eup %1852  ;;  %v427_v60 = vmul.f32 1.442695, %v417_v36 }
 0x43b   :  { %v442_v61 = vsel %vm390_vm11, %v2177_v48, 0.0 }
 0x43c   :  { %1854 = vpow2.f32 %v427_v60  ;;  %443 = vadd.xlane.f32.xlu0 %v442_v61 }
 0x43f   :  { %v402_v44 = vpop.xlane.xlu1 %401 }
 0x440   :  { %v418_v49 = vsub.f32 %v385_v4, %v402_v44 }
 0x442   :  { %v2181_v51 = vpop.eup %1854  ;;  %v429_v52 = vmul.f32 1.442695, %v418_v49 }
 0x443   :  { %v445_v54 = vsel %vm390_vm11, %v2181_v51, 0.0 }
 0x444   :  { %1856 = vpow2.f32 %v429_v52  ;;  %446 = vadd.xlane.f32.xlu2 %v445_v54 }
 0x447   :  { %v405_v59 = vpop.xlane.xlu1 %404 }
 0x448   :  { %v419_v56 = vsub.f32 %v386_v9, %v405_v59 }
 0x44a   :  { %v2185_v62 = vpop.eup %1856  ;;  %v431_v63 = vmul.f32 1.442695, %v419_v56 }
 0x44b   :  { %v448_v0 = vsel %vm390_vm11, %v2185_v62, 0.0 }
 0x44c   :  { %1858 = vpow2.f32 %v431_v63  ;;  %449 = vadd.xlane.f32.xlu0 %v448_v0 }
 0x44f   :  { %v408_v1 = vpop.xlane.xlu2 %407 }
 0x450   :  { %v420_v3 = vsub.f32 %v387_v15, %v408_v1 }
 0x452   :  { %v2189_v4 = vpop.eup %1858  ;;  %v433_v5 = vmul.f32 1.442695, %v420_v3 }
 0x453   :  { %v451_v6 = vsel %vm390_vm11, %v2189_v4, 0.0 }
 0x454   :  { %1860 = vpow2.f32 %v433_v5  ;;  %452 = vadd.xlane.f32.xlu1 %v451_v6 }
 0x457   :  { %v411_v8 = vpop.xlane.xlu0 %410  ;;  %v1758_v16 = vpop.permute.xlu2 %1757 }
 0x458   :  { %v421_v9 = vsub.f32 %v388_v20, %v411_v8  ;;  %v1759_v33 = vunpack.i.l.bf16 %v1758_v16  ;;  %v1760_v23 = vunpack.i.h.bf16 %v1758_v16 }
 0x45a   :  { %v1861_v11 = vpop.eup %1860  ;;  %v435_v12 = vmul.f32 1.442695, %v421_v9 }
 0x45b   :  { %v454_v14 = vsel %vm390_vm11, %v1861_v11, 0.0 }
 0x45c   :  { %1862 = vpow2.f32 %v435_v12  ;;  %455 = vadd.xlane.f32.xlu0 %v454_v14  ;;  %1772 = vrot.lane.b32.xlu2 %v1771_v26, %s1948_s27 }
 0x45f   :  { %v414_v15 = vpop.xlane.xlu0 %413  ;;  %v1753_v19 = vpop.permute.xlu1 %1752 }
 0x460   :  { %v422_v17 = vsub.f32 %v389_v31, %v414_v15  ;;  %v1754_v27 = vunpack.i.l.bf16 %v1753_v19  ;;  %v1755_v32 = vunpack.i.h.bf16 %v1753_v19  ;;  %v1763_v37 = vpop.permute.xlu2 %1762 }
 0x461   :  { %v1764_v24 = vunpack.i.l.bf16 %v1763_v37  ;;  %v1765_v38 = vunpack.i.h.bf16 %v1763_v37 }
 0x462   :  { %v1863_v28 = vpop.eup %1862  ;;  %v437_v30 = vmul.f32 1.442695, %v422_v17  ;;  %537 = vmatpush.msrb.mxu2 %v1754_v27 }
 0x463   :  { %v457_v20 = vsel %vm390_vm11, %v1863_v28, 0.0 }
 0x464   :  { %1864 = vpow2.f32 %v437_v30  ;;  %458 = vadd.xlane.f32.xlu1 %v457_v20  ;;  %616 = vrot.lane.b32.xlu2 %v2060_v58, %s1948_s27 }
 0x465   :  { %538 = vmatpush.msrb.mxu2 %v1755_v32 }
 0x467   :  { %539 = vmatpush.msrb.mxu2 %v1759_v33 }
 0x469   :  { %540 = vmatpush.msrb.mxu2 %v1760_v23 }
 0x46a   :  { %v1865_v26 = vpop.eup %1864 }
 0x46b   :  { %541 = vmatpush.msrb.mxu2 %v1764_v24  ;;  %v460_v31 = vsel %vm390_vm11, %v1865_v26, 0.0 }
 0x46c   :  { %461 = vadd.xlane.f32.xlu0 %v460_v31 }
 0x46d   :  { %542 = vmatpush.msrb.mxu2 %v1765_v38 }
 0x47d   :  { %1767 = vrot.lane.b32.xlu1 %v1766_v25, %s1948_s27 }
 0x4a7   :  { %v441_v58 = vpop.xlane.xlu1 %440 }
 0x4a8   :  { %1866 = vrcp.f32 %v441_v58 }
 0x4ae   :  { %v1867_v39 = vpop.eup %1866 }
 0x4af   :  { %v444_v41 = vpop.xlane.xlu0 %443  ;;  %v471_v42 = vmul.f32 %v1867_v39, %v2173_v43 }
 0x4b0   :  { %1868 = vrcp.f32 %v444_v41 }
 0x4b1   :  { %1626 = vmatmul.msk.f32.vlgmr.msrb.gmra.mxu2 %vm390_vm11, %v471_v42 }
 0x4b6   :  { %v1869_v35 = vpop.eup %1868 }
 0x4b7   :  { %v447_v40 = vpop.xlane.xlu2 %446  ;;  %v472_v45 = vmul.f32 %v1869_v35, %v2177_v48 }
 0x4b8   :  { %1870 = vrcp.f32 %v447_v40 }
 0x4b9   :  { %1627 = vmatmul.msk.f32.gmra.mxu2 %vm390_vm11, %v472_v45 }
 0x4be   :  { %v1871_v46 = vpop.eup %1870 }
 0x4bf   :  { %v450_v34 = vpop.xlane.xlu0 %449  ;;  %v473_v21 = vmul.f32 %v1871_v46, %v2181_v51  ;;  %v1773_v12 = vpop.permute.xlu2 %1772 }
 0x4c0   :  { %1872 = vrcp.f32 %v450_v34  ;;  %v1774_v14 = vunpack.i.l.bf16 %v1773_v12  ;;  %v1775_v16 = vunpack.i.h.bf16 %v1773_v12 }
 0x4c1   :  { %1628 = vmatmul.msk.f32.gmra.mxu2 %vm390_vm11, %v473_v21 }
 0x4c6   :  { %v1873_v22 = vpop.eup %1872 }
 0x4c7   :  { %v453_v25 = vpop.xlane.xlu1 %452  ;;  %v474_v43 = vmul.f32 %v1873_v22, %v2185_v62 }
 0x4c8   :  { %1874 = vrcp.f32 %v453_v25 }
 0x4c9   :  { %1629 = vmatmul.msk.f32.gmra.mxu2 %vm390_vm11, %v474_v43 }
 0x4ce   :  { %v1875_v36 = vpop.eup %1874 }
 0x4cf   :  { %v456_v60 = vpop.xlane.xlu0 %455  ;;  %v475_v48 = vmul.f32 %v1875_v36, %v2189_v4 }
 0x4d0   :  { %1876 = vrcp.f32 %v456_v60 }
 0x4d1   :  { %1630 = vmatmul.msk.f32.gmra.mxu2 %vm390_vm11, %v475_v48  ;;  %v702_v48 = vld [vmem:[%s2600_s4 + $0x10] sm:$0xff] }
 0x4d6   :  { %v1877_v61 = vpop.eup %1876 }
 0x4d7   :  { %v459_v44 = vpop.xlane.xlu1 %458  ;;  %v476_v49 = vmul.f32 %v1877_v61, %v1861_v11  ;;  %v701_v61 = vld [vmem:[%s2600_s4 + $0x8] sm:$0xff] }
 0x4d8   :  { %1878 = vrcp.f32 %v459_v44  ;;  %v700_v44 = vld [vmem:[%s2600_s4] sm:$0xff] }
 0x4d9   :  { %1631 = vmatmul.msk.f32.gmra.mxu2 %vm390_vm11, %v476_v49 }
 0x4de   :  { %v1879_v51 = vpop.eup %1878 }
 0x4df   :  { %v462_v52 = vpop.xlane.xlu0 %461  ;;  %v477_v54 = vmul.f32 %v1879_v51, %v1863_v28 }
 0x4e0   :  { %1880 = vrcp.f32 %v462_v52 }
 0x4e1   :  { %1632 = vmatmul.msk.f32.gmra.mxu2 %vm390_vm11, %v477_v54  ;;  %v767_v54 = vld [vmem:[%s2601_s5 + $0x78] sm:$0xff] }
 0x4e6   :  { %v1881_v59 = vpop.eup %1880 }
 0x4e7   :  { %v478_v56 = vmul.f32 %v1881_v59, %v1865_v26  ;;  %v617_v26 = vpop.permute.xlu2 %616  ;;  %v766_v59 = vld [vmem:[%s2601_s5 + $0x70] sm:$0xff] }
 0x4e9   :  { %1633 = vmatmul.msk.f32.gmra.mxu2 %vm390_vm11, %v478_v56  ;;  %v765_v56 = vld [vmem:[%s2601_s5 + $0x68] sm:$0xff] }
 0x4ef   :  { %v1768_v8 = vpop.permute.xlu1 %1767 }
 0x4f0   :  { %v1769_v9 = vunpack.i.l.bf16 %v1768_v8  ;;  %v1770_v11 = vunpack.i.h.bf16 %v1768_v8 }
 0x4f2   :  { %637 = vmatpush.msra.mxu3 %v1769_v9 }
 0x4f4   :  { %638 = vmatpush.msra.mxu3 %v1770_v11 }
 0x4f6   :  { %639 = vmatpush.msra.mxu3 %v1774_v14  ;;  %v694_v14 = vperm.slane %v2057_v57, 1 }
 0x4f8   :  { %640 = vmatpush.msra.mxu3 %v1775_v16 }
 0x4fa   :  { %769 = vmatpush.msrb.mxu3 %v767_v54 }
 0x4fc   :  { %770 = vmatpush.msrb.mxu3 %v766_v59 }
 0x4fe   :  { %771 = vmatpush.msrb.mxu3 %v765_v56 }
 0x534   :  { %v544_v62 = vpop.f32.mrf.mxu2 }
 0x53c   :  { %v547_v63 = vpop.f32.mrf.mxu2 }
 0x544   :  { %v550_v0 = vpop.f32.mrf.mxu2 }
 0x545   :  { %570 = vrot.lane.b32.xlu0 %v550_v0, %s1952_s12  ;;  %v764_v0 = vld [vmem:[%s2601_s5 + $0x60] sm:$0xff] }
 0x546   :  { %772 = vmatpush.msrb.mxu3 %v764_v0 }
 0x54c   :  { %v553_v1 = vpop.f32.mrf.mxu2 }
 0x554   :  { %v556_v3 = vpop.f32.mrf.mxu2 }
 0x555   :  { %578 = vrot.lane.b32.xlu1 %v556_v3, %s1947_s26 }
 0x55c   :  { %v559_v4 = vpop.f32.mrf.mxu2 }
 0x55d   :  { %572 = vrot.lane.b32.xlu1 %v553_v1, %s1952_s12 }
 0x564   :  { %v562_v5 = vpop.f32.mrf.mxu2 }
 0x565   :  { %586 = vrot.lane.b32.xlu0 %v562_v5, %s1953_s13 }
 0x56c   :  { %v565_v6 = vpop.f32.mrf.mxu2 }
 0x56d   :  { %580 = vrot.lane.b32.xlu0 %v559_v4, %s1947_s26  ;;  %588 = vrot.lane.b32.xlu1 %v565_v6, %s1953_s13 }
 0x5b7   :  { %v571_v17 = vpop.permute.xlu0 %570 }
 0x5b8   :  { %v592_v19 = vsel %vm316_vm10, %v544_v62, %v571_v17 }
 0x5c7   :  { %v579_v15 = vpop.permute.xlu1 %578 }
 0x5c8   :  { %v594_v27 = vsel %vm311_vm8, %v592_v19, %v579_v15  ;;  %v697_v19 = vperm.slane %v2057_v57, 2 }
 0x5cf   :  { %v573_v28 = vpop.permute.xlu1 %572 }
 0x5d0   :  { %v593_v32 = vsel %vm316_vm10, %v547_v63, %v573_v28 }
 0x5d7   :  { %v587_v30 = vpop.permute.xlu0 %586 }
 0x5d8   :  { %v597_v20 = vsel %vm596_vm12, %v594_v27, %v587_v30 }
 0x5d9   :  { %1634 = vmatmul.msk.f32.vlgmr.msra.gmra.mxu3 %vm40_vm0, %v597_v20 }
 0x5df   :  { %v581_v33 = vpop.permute.xlu0 %580  ;;  %v589_v37 = vpop.permute.xlu1 %588 }
 0x5e0   :  { %v595_v23 = vsel %vm311_vm8, %v593_v32, %v581_v33 }
 0x5e1   :  { %v598_v24 = vsel %vm596_vm12, %v595_v23, %v589_v37 }
 0x5e2   :  { %1635 = vmatmul.msk.f32.gmra.mxu3 %vm40_vm0, %v598_v24 }
 0x65c   :  { %v642_v31 = vpop.f32.mrf.mxu3 }
 0x65d   :  { %v643_v38 = vadd.f32 %v642_v31, %v617_v26  ;;  %v762_v31 = vld [vmem:[%s2601_s5 + $0x50] sm:$0xff] }
 0x65f   :  { %v648_v58 = vadd.f32 %v643_v38, %v2046_v50  ;;  %v761_v38 = vld [vmem:[%s2601_s5 + $0x48] sm:$0xff] }
 0x661   :  { %v650_v39 = vsel %vm40_vm0, %v648_v58, 0.0 }
 0x662   :  { %651 = vadd.xlane.f32.xlu0 %v650_v39  ;;  %v759_v39 = vld [vmem:[%s2601_s5 + $0x38] sm:$0xff] }
 0x665   :  { %v645_v41 = vpop.f32.mrf.mxu3 }
 0x666   :  { %v646_v42 = vadd.f32 %v645_v41, %v617_v26  ;;  %v763_v26 = vld [vmem:[%s2601_s5 + $0x58] sm:$0xff]  ;;  %v758_v41 = vld [vmem:[%s2601_s5 + $0x30] sm:$0xff] }
 0x667   :  { %773 = vmatpush.msrb.mxu3 %v763_v26  ;;  %v2328_v26 = vld [vmem:[%s2596_s3 + $0x30] sm:$0xff] }
 0x668   :  { %v649_v35 = vadd.f32 %v646_v42, %v2050_v55  ;;  %v703_v55 = vld [vmem:[%s2600_s4 + $0x18] sm:$0xff]  ;;  %v757_v42 = vld [vmem:[%s2601_s5 + $0x28] sm:$0xff] }
 0x669   :  { %723 = vmatpush.msra.mxu0 %v703_v55  ;;  %774 = vmatpush.msrb.mxu3 %v762_v31  ;;  %v2334_v31 = vld [vmem:[%s2596_s3 + $0x28] sm:$0xff] }
 0x66a   :  { %v653_v40 = vsel %vm40_vm0, %v649_v35, 0.0 }
 0x66b   :  { %654 = vadd.xlane.f32.xlu1 %v653_v40  ;;  %724 = vmatpush.msra.mxu0 %v702_v48  ;;  %v755_v40 = vld [vmem:[%s2601_s5 + $0x18] sm:$0xff] }
 0x66c   :  { %775 = vmatpush.msrb.mxu3 %v761_v38  ;;  %v2340_v38 = vld [vmem:[%s2596_s3 + $0x20] sm:$0xff] }
 0x66d   :  { %725 = vmatpush.msra.mxu0 %v701_v61 }
 0x66f   :  { %726 = vmatpush.msra.mxu0 %v700_v44 }
 0x6d5   :  { %v652_v45 = vpop.xlane.xlu0 %651 }
 0x6d6   :  { %v656_v46 = vmul.f32 %v652_v45, %v2007_v10  ;;  %v754_v45 = vld [vmem:[%s2601_s5 + $0x10] sm:$0xff] }
 0x6d8   :  { %v658_v34 = vsub.f32 %v648_v58, %v656_v46  ;;  %v760_v58 = vld [vmem:[%s2601_s5 + $0x40] sm:$0xff]  ;;  %v753_v46 = vld [vmem:[%s2601_s5 + $0x8] sm:$0xff] }
 0x6d9   :  { %776 = vmatpush.msrb.mxu3 %v760_v58 }
 0x6da   :  { %v660_v21 = vmul.f32 %v658_v34, %v658_v34 }
 0x6db   :  { %777 = vmatpush.msrb.mxu3 %v759_v39  ;;  %v1839_v39 = vpack.i.bf16 %v2340_v38, %v2334_v31 }
 0x6dc   :  { %v662_v22 = vsel %vm40_vm0, %v660_v21, 0.0  ;;  %v704_v21 = vperm.slane %v2057_v57, 3 }
 0x6dd   :  { %663 = vadd.xlane.f32.xlu2 %v662_v22  ;;  %778 = vmatpush.msrb.mxu3 %v758_v41 }
 0x6de   :  { %v655_v25 = vpop.xlane.xlu1 %654 }
 0x6df   :  { %v657_v50 = vmul.f32 %v655_v25, %v2007_v10  ;;  %779 = vmatpush.msrb.mxu3 %v757_v42 }
 0x6e1   :  { %v659_v43 = vsub.f32 %v649_v35, %v657_v50  ;;  %v756_v35 = vld [vmem:[%s2601_s5 + $0x20] sm:$0xff] }
 0x6e2   :  { %780 = vmatpush.msrb.mxu3 %v756_v35 }
 0x6e3   :  { %v661_v36 = vmul.f32 %v659_v43, %v659_v43 }
 0x6e4   :  { %781 = vmatpush.msrb.mxu3 %v755_v40 }
 0x6e5   :  { %v665_v60 = vsel %vm40_vm0, %v661_v36, 0.0 }
 0x6e6   :  { %666 = vadd.xlane.f32.xlu0 %v665_v60  ;;  %782 = vmatpush.msrb.mxu3 %v754_v45 }
 0x6e8   :  { %783 = vmatpush.msrb.mxu3 %v753_v46 }
 0x750   :  { %v664_v49 = vpop.xlane.xlu2 %663 }
 0x751   :  { %v668_v51 = vmul.f32 %v664_v49, %v2007_v10 }
 0x753   :  { %v670_v52 = vadd.f32 1e-12, %v668_v51 }
 0x755   :  { %1882 = vrsqrt.f32 %v670_v52  ;;  %vm678_vm14 = vweird.f32 %v670_v52 }
 0x759   :  { %v667_v62 = vpop.xlane.xlu0 %666 }
 0x75a   :  { %v669_v63 = vmul.f32 %v667_v62, %v2007_v10 }
 0x75b   :  { %v1883_v1 = vpop.eup %1882 }
 0x75c   :  { %v673_v3 = vmul.f32 %v1883_v1, %v670_v52  ;;  %v671_v4 = vadd.f32 1e-12, %v669_v63  ;;  %vm679_vm13 = vweird.f32 %v1883_v1 }
 0x75d   :  { %vm680_vm15 = vmor %vm678_vm14, %vm679_vm13 }
 0x75e   :  { %v674_v5 = vmul.f32 %v1883_v1, %v673_v3  ;;  %1884 = vrsqrt.f32 %v671_v4  ;;  %vm688_vm2 = vweird.f32 %v671_v4 }
 0x760   :  { %v675_v6 = vmul.f32 0.5, %v674_v5  ;;  %v768_v5 = vperm.slane %v2057_v57, 4 }
 0x762   :  { %v676_v8 = vsub.f32 1.5, %v675_v6 }
 0x764   :  { %v1885_v9 = vpop.eup %1884  ;;  %v677_v11 = vmul.f32 %v1883_v1, %v676_v8 }
 0x765   :  { %v683_v12 = vmul.f32 %v1885_v9, %v671_v4  ;;  %vm689_vm1 = vweird.f32 %v1885_v9 }
 0x766   :  { %v681_v16 = vsel %vm680_vm15, %v1883_v1, %v677_v11  ;;  %vm690_vm3 = vmor %vm688_vm2, %vm689_vm1 }
 0x767   :  { %v684_v15 = vmul.f32 %v1885_v9, %v683_v12  ;;  %v692_v17 = vmul.f32 %v681_v16, %v658_v34  ;;  %v752_v34 = vld [vmem:[%s2601_s5] sm:$0xff] }
 0x768   :  { %784 = vmatpush.msrb.mxu3 %v752_v34 }
 0x769   :  { %v685_v27 = vmul.f32 0.5, %v684_v15  ;;  %v695_v28 = vmul.f32 %v694_v14, %v692_v17 }
 0x76b   :  { %v686_v30 = vsub.f32 1.5, %v685_v27  ;;  %v2269_v20 = vadd.f32 %v697_v19, %v695_v28 }
 0x76d   :  { %v687_v32 = vmul.f32 %v1885_v9, %v686_v30  ;;  %1636 = vmatmul.msk.f32.vlgmr.msra.gmra.mxu0 %vm40_vm0, %v2269_v20 }
 0x76f   :  { %v691_v33 = vsel %vm690_vm3, %v1885_v9, %v687_v32 }
 0x770   :  { %v693_v37 = vmul.f32 %v691_v33, %v659_v43 }
 0x772   :  { %v696_v23 = vmul.f32 %v694_v14, %v693_v37 }
 0x774   :  { %v699_v24 = vadd.f32 %v697_v19, %v696_v23 }
 0x776   :  { %1637 = vmatmul.msk.f32.gmra.mxu0 %vm40_vm0, %v699_v24 }
 0x7ea   :  { %v728_v22 = vpop.f32.mrf.mxu0 }
 0x7eb   :  { %v729_v25 = vadd.f32 %v728_v22, %v704_v21 }
 0x7ed   :  { %v736_v50 = vmul.f32 0.044715, %v729_v25  ;;  %v734_v59 = vmul.f32 0.5, %v729_v25 }
 0x7ef   :  { %v738_v43 = vmul.f32 %v736_v50, %v729_v25 }
 0x7f1   :  { %v740_v36 = vmul.f32 %v738_v43, %v729_v25 }
 0x7f3   :  { %v731_v60 = vpop.f32.mrf.mxu0  ;;  %v742_v55 = vadd.f32 %v740_v36, %v729_v25 }
 0x7f4   :  { %v732_v48 = vadd.f32 %v731_v60, %v704_v21 }
 0x7f5   :  { %v744_v61 = vmul.f32 0.7978846, %v742_v55  ;;  %v838_v55 = vperm.slane %v2057_v57, 5 }
 0x7f6   :  { %v737_v44 = vmul.f32 0.044715, %v732_v48  ;;  %v735_v1 = vmul.f32 0.5, %v732_v48 }
 0x7f7   :  { %1886 = vtanh.f32 %v744_v61 }
 0x7f8   :  { %v739_v49 = vmul.f32 %v737_v44, %v732_v48 }
 0x7fa   :  { %v741_v51 = vmul.f32 %v739_v49, %v732_v48  ;;  %v841_v49 = vperm.slane %v2057_v57, 6 }
 0x7fc   :  { %v743_v52 = vadd.f32 %v741_v51, %v732_v48 }
 0x7fd   :  { %v1887_v54 = vpop.eup %1886 }
 0x7fe   :  { %v748_v56 = vadd.f32 1.0, %v1887_v54  ;;  %v745_v62 = vmul.f32 0.7978846, %v743_v52 }
 0x800   :  { %v750_v63 = vmul.f32 %v748_v56, %v734_v59  ;;  %1888 = vtanh.f32 %v745_v62 }
 0x802   :  { %785 = vmatmul.f32.vlgmr.msrb.gmra.mxu3 %v750_v63 }
 0x806   :  { %v1889_v0 = vpop.eup %1888 }
 0x807   :  { %v749_v3 = vadd.f32 1.0, %v1889_v0 }
 0x809   :  { %v751_v4 = vmul.f32 %v749_v3, %v735_v1  ;;  %v2362_v3 = vld [vmem:[%s2598_s6 + $0x8] sm:$0xff] }
 0x80b   :  { %788 = vmatmul.f32.gmra.mxu3 %v751_v4  ;;  %v2365_v4 = vperm.slane %v2362_v3, 0 }
 0x885   :  { %v786_v6 = vpop.f32.mrf.mxu3 }
 0x886   :  { %v787_v8 = vadd.f32 %v786_v6, %v768_v5 }
 0x888   :  { %v792_v9 = vadd.f32 %v787_v8, %v2269_v20 }
 0x88a   :  { %v794_v11 = vsel %vm40_vm0, %v792_v9, 0.0 }
 0x88b   :  { %795 = vadd.xlane.f32.xlu1 %v794_v11 }
 0x88e   :  { %v789_v12 = vpop.f32.mrf.mxu3 }
 0x88f   :  { %v790_v14 = vadd.f32 %v789_v12, %v768_v5 }
 0x891   :  { %v793_v16 = vadd.f32 %v790_v14, %v699_v24  ;;  %v2322_v24 = vld [vmem:[%s2596_s3 + $0x38] sm:$0xff] }
 0x892   :  { %870 = vmatpush.msrb.mxu0 %v2322_v24  ;;  %v1834_v58 = vpack.i.bf16 %v2328_v26, %v2322_v24 }
 0x893   :  { %v797_v15 = vsel %vm40_vm0, %v793_v16, 0.0 }
 0x894   :  { %798 = vadd.xlane.f32.xlu2 %v797_v15  ;;  %871 = vmatpush.msrb.mxu0 %v2328_v26 }
 0x896   :  { %872 = vmatpush.msrb.mxu0 %v2334_v31 }
 0x898   :  { %873 = vmatpush.msrb.mxu0 %v2340_v38 }
 0x8fe   :  { %v796_v17 = vpop.xlane.xlu1 %795 }
 0x8ff   :  { %v800_v19 = vmul.f32 %v796_v17, %v2007_v10 }
 0x901   :  { %v802_v27 = vsub.f32 %v792_v9, %v800_v19 }
 0x903   :  { %v804_v28 = vmul.f32 %v802_v27, %v802_v27 }
 0x905   :  { %v806_v30 = vsel %vm40_vm0, %v804_v28, 0.0 }
 0x906   :  { %807 = vadd.xlane.f32.xlu0 %v806_v30 }
 0x907   :  { %v799_v32 = vpop.xlane.xlu2 %798 }
 0x908   :  { %v801_v20 = vmul.f32 %v799_v32, %v2007_v10 }
 0x90a   :  { %v803_v33 = vsub.f32 %v793_v16, %v801_v20 }
 0x90c   :  { %v805_v37 = vmul.f32 %v803_v33, %v803_v33 }
 0x90e   :  { %v809_v23 = vsel %vm40_vm0, %v805_v37, 0.0 }
 0x90f   :  { %810 = vadd.xlane.f32.xlu1 %v809_v23 }
 0x979   :  { %v808_v41 = vpop.xlane.xlu0 %807 }
 0x97a   :  { %v812_v42 = vmul.f32 %v808_v41, %v2007_v10 }
 0x97c   :  { %v814_v35 = vadd.f32 1e-12, %v812_v42 }
 0x97e   :  { %1890 = vrsqrt.f32 %v814_v35  ;;  %vm822_vm5 = vweird.f32 %v814_v35 }
 0x982   :  { %v811_v40 = vpop.xlane.xlu1 %810 }
 0x983   :  { %v813_v45 = vmul.f32 %v811_v40, %v2007_v10 }
 0x984   :  { %v1891_v46 = vpop.eup %1890 }
 0x985   :  { %v817_v34 = vmul.f32 %v1891_v46, %v814_v35  ;;  %v815_v21 = vadd.f32 1e-12, %v813_v45  ;;  %vm823_vm4 = vweird.f32 %v1891_v46 }
 0x986   :  { %vm824_vm6 = vmor %vm822_vm5, %vm823_vm4 }
 0x987   :  { %v818_v22 = vmul.f32 %v1891_v46, %v817_v34  ;;  %1892 = vrsqrt.f32 %v815_v21  ;;  %vm832_vm13 = vweird.f32 %v815_v21 }
 0x989   :  { %v819_v25 = vmul.f32 0.5, %v818_v22 }
 0x98b   :  { %v820_v50 = vsub.f32 1.5, %v819_v25 }
 0x98d   :  { %v1893_v43 = vpop.eup %1892  ;;  %v821_v36 = vmul.f32 %v1891_v46, %v820_v50 }
 0x98e   :  { %v827_v60 = vmul.f32 %v1893_v43, %v815_v21  ;;  %vm833_vm7 = vweird.f32 %v1893_v43 }
 0x98f   :  { %v825_v48 = vsel %vm824_vm6, %v1891_v46, %v821_v36  ;;  %vm834_vm14 = vmor %vm832_vm13, %vm833_vm7  ;;  %vm1592_vm6 = vcmask 1040384   ;;  %vm1596_vm7 = vcmask 254976   ;;  %vm1610_vm13 = vcmask 1024  }
 0x990   :  { %v836_v61 = vmul.f32 %v825_v48, %v802_v27  ;;  %v828_v44 = vmul.f32 %v1893_v43, %v827_v60 }
 0x992   :  { %v829_v51 = vmul.f32 0.5, %v828_v44  ;;  %v839_v52 = vmul.f32 %v838_v55, %v836_v61 }
 0x994   :  { %v830_v54 = vsub.f32 1.5, %v829_v51  ;;  %v2351_v59 = vadd.f32 %v841_v49, %v839_v52 }
 0x996   :  { %v831_v56 = vmul.f32 %v1893_v43, %v830_v54  ;;  %1643 = vmatmul.msk.f32.vlgmr.msrb.gmra.mxu0 %vm40_vm0, %v2351_v59 }
 0x998   :  { %v835_v62 = vsel %vm834_vm14, %v1893_v43, %v831_v56 }
 0x999   :  { %v837_v63 = vmul.f32 %v835_v62, %v803_v33 }
 0x99b   :  { %v840_v0 = vmul.f32 %v838_v55, %v837_v63 }
 0x99d   :  { %v2355_v1 = vadd.f32 %v841_v49, %v840_v0 }
 0x99f   :  { %1644 = vmatmul.msk.f32.gmra.mxu0 %vm40_vm0, %v2355_v1 }
 0xa13   :  { %v875_v57 = vpop.f32.mrf.mxu0 }
 0xa14   :  { %v2368_v6 = vadd.f32 %v875_v57, %v2365_v4 }
 0xa1c   :  { %v878_v5 = vpop.f32.mrf.mxu0 }
 0xa1d   :  { %v2371_v8 = vadd.f32 %v878_v5, %v2365_v4 }
 0xa1f   :  { %v1786_v9 = vpack.i.bf16 %v2371_v8, %v2368_v6 }
 0xa21   :  { %1787 = vrot.lane.b32.xlu1 %v1786_v9, %s1942_s21  ;;  %1782 = vrot.lane.b32.xlu0 %v1786_v9, %s1944_s23 }
 0xa22   :  { %1777 = vrot.lane.b32.xlu2 %v1786_v9, %s1943_s22 }
 0xa29   :  { %1792 = vrot.lane.b32.xlu0 %v1786_v9, %s1941_s20 }
 0xa7c   :  { %v1778_v11 = vpop.permute.xlu2 %1777 }
 0xa7d   :  { %v1779_v14 = vunpack.i.l.bf16 %v1778_v11  ;;  %v1780_v28 = vunpack.i.h.bf16 %v1778_v11 }
 0xa93   :  { %v1783_v12 = vpop.permute.xlu0 %1782  ;;  %v1788_v17 = vpop.permute.xlu1 %1787 }
 0xa94   :  { %v1784_v16 = vunpack.i.l.bf16 %v1783_v12  ;;  %v1785_v19 = vunpack.i.h.bf16 %v1783_v12  ;;  %v1789_v30 = vunpack.i.l.bf16 %v1788_v17  ;;  %v1790_v23 = vunpack.i.h.bf16 %v1788_v17 }
 0xa96   :  { %v1796_v15 = vpack.i.bf16 %v1784_v16, %v1779_v14  ;;  %v1798_v20 = vpack.i.bf16 %v1785_v19, %v1780_v28 }
 0xa98   :  { %1797 = vxpose.xlu2.b32.start [1/2] (short) (narrow) %v1796_v15, 8 }
 0xa9b   :  { %v1793_v27 = vpop.permute.xlu0 %1792 }
 0xa9c   :  { %v1794_v32 = vunpack.i.l.bf16 %v1793_v27  ;;  %v1795_v37 = vunpack.i.h.bf16 %v1793_v27 }
 0xa9e   :  { %v1805_v33 = vpack.i.bf16 %v1794_v32, %v1789_v30  ;;  %v1807_v41 = vpack.i.bf16 %v1795_v37, %v1790_v23 }
 0xaa0   :  { %1806 = vxpose.xlu0.b32.start [1/2] (short) (narrow) %v1805_v33, 8  ;;  %1799 = vxpose.xlu2.b32.end [2/2] (short) (narrow) %v1798_v20, 8 }
 0xaa8   :  { %1808 = vxpose.xlu0.b32.end [2/2] (short) (narrow) %v1807_v41, 8 }
 0xb09   :  { %887 = vrot.lane.b32.xlu2 %v2368_v6, %s1946_s25 }
 0xb16   :  { %889 = vrot.lane.b32.xlu0 %v2371_v8, %s1946_s25 }
 0xb31   :  { %v1800_v42 = vpop.trf.xlu2 }
 0xb32   :  { %v1801_v35 = vunpack.i.l.bf16 %v1800_v42  ;;  %v1804_v40 = vunpack.i.h.bf16 %v1800_v42 }
 0xb34   :  { %1048 = vrot.lane.b32.xlu1 %v1801_v35, %s1947_s26 }
 0xb3c   :  { %1052 = vrot.lane.b32.xlu1 %v1804_v40, %s1948_s27 }
 0xb44   :  { %v1809_v45 = vpop.trf.xlu0 }
 0xb45   :  { %v1810_v46 = vunpack.i.l.bf16 %v1809_v45  ;;  %v1813_v43 = vunpack.i.h.bf16 %v1809_v45 }
 0xb47   :  { %1056 = vrot.lane.b32.xlu1 %v1810_v46, %s1949_s28 }
 0xb4f   :  { %883 = vrot.lane.b32.xlu1 %v2368_v6, %s1945_s24 }
 0xb57   :  { %885 = vrot.lane.b32.xlu1 %v2371_v8, %s1945_s24 }
 0xb5f   :  { %891 = vrot.lane.b32.xlu1 %v2368_v6, %s1950_s29 }
 0xb63   :  { %v888_v34 = vpop.permute.xlu2 %887 }
 0xb67   :  { %893 = vrot.lane.b32.xlu1 %v2371_v8, %s1950_s29 }
 0xb88   :  { %v890_v21 = vpop.permute.xlu0 %889 }
 0xb89   :  { %v1819_v22 = vpack.i.bf16 %v888_v34, %v890_v21 }
 0xb8b   :  { %1820 = vrot.lane.b32.xlu0 %v1819_v22, %s1951_s30 }
 0xba6   :  { %v1049_v25 = vpop.permute.xlu1 %1048 }
 0xba7   :  { %v1059_v36 = vsel %vm311_vm8, %v1813_v43, %v1049_v25 }
 0xbae   :  { %v1053_v50 = vpop.permute.xlu1 %1052 }
 0xbaf   :  { %v1060_v60 = vsel %vm40_vm0, %v1059_v36, %v1053_v50 }
 0xbb9   :  { %v1057_v55 = vpop.permute.xlu1 %1056 }
 0xbba   :  { %v1061_v48 = vsel %vm314_vm9, %v1060_v60, %v1057_v55 }
 0xbbb   :  { %1093 = vmatpush.msra.mxu0 %v1061_v48 }
 0xbbc   :  { %1645 = vmatmul.msk.f32.vlgmr.msra.gmra.mxu0 %vm316_vm10, %v2368_v6 }
 0xbc1   :  { %v2400_v61 = vpop.permute.xlu1 %883 }
 0xbc4   :  { %1646 = vmatmul.msk.f32.gmra.mxu0 %vm316_vm10, %v2371_v8 }
 0xbc9   :  { %v886_v44 = vpop.permute.xlu1 %885 }
 0xbca   :  { %v1824_v49 = vpack.i.bf16 %v2400_v61, %v886_v44 }
 0xbcc   :  { %1647 = vmatmul.msk.f32.gmra.mxu0 %vm316_vm10, %v2400_v61 }
 0xbd1   :  { %v892_v51 = vpop.permute.xlu1 %891 }
 0xbd4   :  { %1648 = vmatmul.msk.f32.gmra.mxu0 %vm316_vm10, %v886_v44 }
 0xbd9   :  { %v894_v52 = vpop.permute.xlu1 %893 }
 0xbda   :  { %v1814_v54 = vpack.i.bf16 %v892_v51, %v894_v52 }
 0xbdc   :  { %1649 = vmatmul.msk.f32.gmra.mxu0 %vm316_vm10, %v888_v34  ;;  %1815 = vrot.lane.b32.xlu1 %v1814_v54, %s1951_s30 }
 0xbe4   :  { %1650 = vmatmul.msk.f32.gmra.mxu0 %vm316_vm10, %v890_v21 }
 0xbec   :  { %1651 = vmatmul.msk.f32.gmra.mxu0 %vm316_vm10, %v892_v51 }
 0xbf4   :  { %1652 = vmatmul.msk.f32.gmra.mxu0 %vm316_vm10, %v894_v52 }
 0xbfd   :  { %v1821_v15 = vpop.permute.xlu0 %1820 }
 0xbfe   :  { %v1822_v28 = vunpack.i.l.bf16 %v1821_v15  ;;  %v1823_v30 = vunpack.i.h.bf16 %v1821_v15 }
 0xc39   :  { %v1095_v56 = vpop.f32.mrf.mxu0 }
 0xc41   :  { %v1098_v62 = vpop.f32.mrf.mxu0 }
 0xc42   :  { %v1120_v63 = vmul.f32 0.35355338, %v1098_v62 }
 0xc44   :  { %v1128_v0 = vadd.f32 %v1120_v63, %v2119_v47 }
 0xc46   :  { %v1138_v57 = vsel %vm390_vm11, %v1128_v0, -inf }
 0xc47   :  { %1139 = vmax.xlane.f32.xlu1 %v1138_v57 }
 0xc49   :  { %v1101_v5 = vpop.f32.mrf.mxu0 }
 0xc4a   :  { %v1121_v9 = vmul.f32 0.35355338, %v1101_v5 }
 0xc4c   :  { %v1129_v11 = vadd.f32 %v1121_v9, %v2126_v53 }
 0xc4e   :  { %v1816_v12 = vpop.permute.xlu1 %1815  ;;  %v1141_v14 = vsel %vm390_vm11, %v1129_v11, -inf }
 0xc4f   :  { %v1817_v16 = vunpack.i.l.bf16 %v1816_v12  ;;  %1142 = vmax.xlane.f32.xlu1 %v1141_v14  ;;  %v1818_v17 = vunpack.i.h.bf16 %v1816_v12 }
 0xc51   :  { %v1104_v19 = vpop.f32.mrf.mxu0  ;;  %1279 = vmatpush.msrb.mxu0 %v1817_v16  ;;  %1685 = vmatpush.msra.mxu3 %v1817_v16 }
 0xc52   :  { %v1122_v27 = vmul.f32 0.35355338, %v1104_v19 }
 0xc53   :  { %1280 = vmatpush.msrb.mxu0 %v1818_v17  ;;  %1686 = vmatpush.msra.mxu3 %v1818_v17 }
 0xc54   :  { %v1130_v47 = vadd.f32 %v1122_v27, %v2133_v2 }
 0xc55   :  { %1281 = vmatpush.msrb.mxu0 %v1822_v28  ;;  %1687 = vmatpush.msra.mxu3 %v1822_v28 }
 0xc56   :  { %v1144_v53 = vsel %vm390_vm11, %v1130_v47, -inf }
 0xc57   :  { %1145 = vmax.xlane.f32.xlu1 %v1144_v53  ;;  %1282 = vmatpush.msrb.mxu0 %v1823_v30 }
 0xc58   :  { %1688 = vmatpush.msra.mxu3 %v1823_v30 }
 0xc59   :  { %v1107_v32 = vpop.f32.mrf.mxu0 }
 0xc5a   :  { %v1123_v20 = vmul.f32 0.35355338, %v1107_v32 }
 0xc5c   :  { %v1131_v33 = vadd.f32 %v1123_v20, %v2140_v7 }
 0xc5e   :  { %v1147_v37 = vsel %vm390_vm11, %v1131_v33, -inf }
 0xc5f   :  { %1148 = vmax.xlane.f32.xlu1 %v1147_v37 }
 0xc61   :  { %v1110_v23 = vpop.f32.mrf.mxu0 }
 0xc62   :  { %v1124_v41 = vmul.f32 0.35355338, %v1110_v23 }
 0xc64   :  { %v1132_v42 = vadd.f32 %v1124_v41, %v2147_v13  ;;  %v1829_v13 = vpack.i.bf16 %v2368_v6, %v2371_v8  ;;  %v1938_v6 = vld [vmem:[%s2599_s1] sm:$0xff] }
 0xc66   :  { %v1150_v2 = vsel %vm390_vm11, %v1132_v42, -inf }
 0xc67   :  { %1151 = vmax.xlane.f32.xlu1 %v1150_v2 }
 0xc69   :  { %v1113_v35 = vpop.f32.mrf.mxu0 }
 0xc6a   :  { %v1125_v40 = vmul.f32 0.35355338, %v1113_v35 }
 0xc6c   :  { %v1133_v45 = vadd.f32 %v1125_v40, %v2154_v18 }
 0xc6e   :  { %v1153_v46 = vsel %vm390_vm11, %v1133_v45, -inf }
 0xc6f   :  { %1154 = vmax.xlane.f32.xlu1 %v1153_v46 }
 0xc71   :  { %v1116_v34 = vpop.f32.mrf.mxu0 }
 0xc72   :  { %v1126_v21 = vmul.f32 0.35355338, %v1116_v34 }
 0xc74   :  { %v1134_v7 = vadd.f32 %v1126_v21, %v2161_v29  ;;  %v1119_v29 = vmul.f32 0.35355338, %v1095_v56 }
 0xc76   :  { %v1156_v22 = vsel %vm390_vm11, %v1134_v7, -inf  ;;  %v2438_v8 = vadd.f32 %v1938_v6, %v1119_v29 }
 0xc77   :  { %1157 = vmax.xlane.f32.xlu2 %v1156_v22 }
 0xc78   :  { %v1135_v52 = vsel %vm390_vm11, %v2438_v8, -inf }
 0xc88   :  { %1825 = vrot.lane.b32.xlu1 %v1824_v49, %s1951_s30 }
 0xc90   :  { %1830 = vrot.lane.b32.xlu1 %v1829_v13, %s1951_s30 }
 0xcba   :  { %v1140_v25 = vpop.xlane.xlu1 %1139 }
 0xcbb   :  { %v1160_v50 = vsub.f32 %v1128_v0, %v1140_v25 }
 0xcbd   :  { %v1169_v18 = vmul.f32 1.442695, %v1160_v50 }
 0xcbf   :  { %1894 = vpow2.f32 %v1169_v18 }
 0xcc2   :  { %v1143_v43 = vpop.xlane.xlu1 %1142 }
 0xcc3   :  { %v1161_v36 = vsub.f32 %v1129_v11, %v1143_v43 }
 0xcc5   :  { %v2431_v60 = vpop.eup %1894  ;;  %v1171_v55 = vmul.f32 1.442695, %v1161_v36 }
 0xcc6   :  { %v1186_v48 = vsel %vm390_vm11, %v2431_v60, 0.0 }
 0xcc7   :  { %1896 = vpow2.f32 %v1171_v55  ;;  %1187 = vadd.xlane.f32.xlu0 %v1186_v48 }
 0xcca   :  { %v1146_v61 = vpop.xlane.xlu1 %1145 }
 0xccb   :  { %v1162_v44 = vsub.f32 %v1130_v47, %v1146_v61 }
 0xccd   :  { %v2440_v49 = vpop.eup %1896  ;;  %v1173_v51 = vmul.f32 1.442695, %v1162_v44 }
 0xcce   :  { %v1189_v54 = vsel %vm390_vm11, %v2440_v49, 0.0 }
 0xccf   :  { %1898 = vpow2.f32 %v1173_v51  ;;  %1136 = vmax.xlane.f32.xlu0 %v1135_v52  ;;  %1190 = vadd.xlane.f32.xlu1 %v1189_v54 }
 0xcd2   :  { %v1149_v56 = vpop.xlane.xlu1 %1148 }
 0xcd3   :  { %v1163_v62 = vsub.f32 %v1131_v33, %v1149_v56 }
 0xcd5   :  { %v2446_v63 = vpop.eup %1898  ;;  %v1175_v0 = vmul.f32 1.442695, %v1163_v62 }
 0xcd6   :  { %v1192_v57 = vsel %vm390_vm11, %v2446_v63, 0.0 }
 0xcd7   :  { %1900 = vpow2.f32 %v1175_v0  ;;  %1193 = vadd.xlane.f32.xlu2 %v1192_v57 }
 0xcda   :  { %v1152_v5 = vpop.xlane.xlu1 %1151 }
 0xcdb   :  { %v1164_v9 = vsub.f32 %v1132_v42, %v1152_v5 }
 0xcdd   :  { %v2450_v11 = vpop.eup %1900  ;;  %v1177_v12 = vmul.f32 1.442695, %v1164_v9 }
 0xcde   :  { %v1195_v14 = vsel %vm390_vm11, %v2450_v11, 0.0 }
 0xcdf   :  { %1902 = vpow2.f32 %v1177_v12  ;;  %1196 = vadd.xlane.f32.xlu2 %v1195_v14 }
 0xce2   :  { %v1155_v16 = vpop.xlane.xlu1 %1154 }
 0xce3   :  { %v1165_v15 = vsub.f32 %v1133_v45, %v1155_v16 }
 0xce5   :  { %v1903_v17 = vpop.eup %1902  ;;  %v1179_v19 = vmul.f32 1.442695, %v1165_v15 }
 0xce6   :  { %v1198_v27 = vsel %vm390_vm11, %v1903_v17, 0.0 }
 0xce7   :  { %1904 = vpow2.f32 %v1179_v19  ;;  %1199 = vadd.xlane.f32.xlu2 %v1198_v27 }
 0xcea   :  { %v1158_v28 = vpop.xlane.xlu2 %1157 }
 0xceb   :  { %v1166_v47 = vsub.f32 %v1134_v7, %v1158_v28 }
 0xced   :  { %v1905_v30 = vpop.eup %1904  ;;  %v1181_v53 = vmul.f32 1.442695, %v1166_v47 }
 0xcee   :  { %v1201_v32 = vsel %vm390_vm11, %v1905_v30, 0.0 }
 0xcef   :  { %1906 = vpow2.f32 %v1181_v53  ;;  %1202 = vadd.xlane.f32.xlu0 %v1201_v32 }
 0xcf5   :  { %v1907_v20 = vpop.eup %1906 }
 0xcf6   :  { %v1204_v33 = vsel %vm390_vm11, %v1907_v20, 0.0 }
 0xcf7   :  { %1205 = vadd.xlane.f32.xlu2 %v1204_v33 }
 0xcfa   :  { %v1826_v37 = vpop.permute.xlu1 %1825 }
 0xcfb   :  { %v1827_v23 = vunpack.i.l.bf16 %v1826_v37  ;;  %v1828_v41 = vunpack.i.h.bf16 %v1826_v37 }
 0xcfd   :  { %1283 = vmatpush.msrb.mxu0 %v1827_v23  ;;  %1689 = vmatpush.msra.mxu3 %v1827_v23 }
 0xcff   :  { %1284 = vmatpush.msrb.mxu0 %v1828_v41  ;;  %1690 = vmatpush.msra.mxu3 %v1828_v41 }
 0xd02   :  { %v1831_v42 = vpop.permute.xlu1 %1830 }
 0xd03   :  { %v1832_v2 = vunpack.i.l.bf16 %v1831_v42  ;;  %v1833_v35 = vunpack.i.h.bf16 %v1831_v42 }
 0xd05   :  { %1285 = vmatpush.msrb.mxu0 %v1832_v2  ;;  %1691 = vmatpush.msra.mxu3 %v1832_v2 }
 0xd07   :  { %1286 = vmatpush.msrb.mxu0 %v1833_v35  ;;  %1692 = vmatpush.msra.mxu3 %v1833_v35 }
 0xd0f   :  { %1835 = vrot.lane.b32.xlu2 %v1834_v58, %s1948_s27 }
 0xd3a   :  { %v1188_v40 = vpop.xlane.xlu0 %1187 }
 0xd3b   :  { %1908 = vrcp.f32 %v1188_v40 }
 0xd41   :  { %v1909_v45 = vpop.eup %1908 }
 0xd42   :  { %v1216_v46 = vmul.f32 %v1909_v45, %v2431_v60  ;;  %v1137_v34 = vpop.xlane.xlu0 %1136  ;;  %v1191_v21 = vpop.xlane.xlu1 %1190 }
 0xd43   :  { %v1159_v7 = vsub.f32 %v2438_v8, %v1137_v34  ;;  %1910 = vrcp.f32 %v1191_v21  ;;  %v1666_v21 = vld [vmem:[%s2600_s4 + $0x38] sm:$0xff] }
 0xd44   :  { %1654 = vmatmul.msk.f32.vlgmr.msra.gmra.mxu3 %vm390_vm11, %v1216_v46  ;;  %1467 = vmatpush.msra.mxu2 %v1666_v21 }
 0xd45   :  { %v1167_v22 = vmul.f32 1.442695, %v1159_v7  ;;  %v1665_v7 = vld [vmem:[%s2600_s4 + $0x30] sm:$0xff] }
 0xd46   :  { %1468 = vmatpush.msra.mxu2 %v1665_v7 }
 0xd47   :  { %1912 = vpow2.f32 %v1167_v22 }
 0xd49   :  { %v1911_v13 = vpop.eup %1910 }
 0xd4a   :  { %v1194_v25 = vpop.xlane.xlu2 %1193  ;;  %v1217_v50 = vmul.f32 %v1911_v13, %v2440_v49 }
 0xd4b   :  { %1914 = vrcp.f32 %v1194_v25 }
 0xd4c   :  { %1655 = vmatmul.msk.f32.gmra.mxu3 %vm390_vm11, %v1217_v50 }
 0xd4d   :  { %v1913_v24 = vpop.eup %1912 }
 0xd4e   :  { %v1183_v26 = vsel %vm390_vm11, %v1913_v24, 0.0 }
 0xd4f   :  { %1184 = vadd.xlane.f32.xlu0 %v1183_v26 }
 0xd51   :  { %v1915_v58 = vpop.eup %1914 }
 0xd52   :  { %v1197_v18 = vpop.xlane.xlu2 %1196  ;;  %v1218_v43 = vmul.f32 %v1915_v58, %v2446_v63 }
 0xd53   :  { %1916 = vrcp.f32 %v1197_v18 }
 0xd54   :  { %1656 = vmatmul.msk.f32.gmra.mxu3 %vm390_vm11, %v1218_v43  ;;  %v1664_v43 = vld [vmem:[%s2600_s4 + $0x28] sm:$0xff] }
 0xd55   :  { %1469 = vmatpush.msra.mxu2 %v1664_v43 }
 0xd59   :  { %v1917_v36 = vpop.eup %1916 }
 0xd5a   :  { %v1200_v60 = vpop.xlane.xlu2 %1199  ;;  %v1219_v55 = vmul.f32 %v1917_v36, %v2450_v11  ;;  %v1663_v36 = vld [vmem:[%s2600_s4 + $0x20] sm:$0xff] }
 0xd5b   :  { %1918 = vrcp.f32 %v1200_v60  ;;  %1470 = vmatpush.msra.mxu2 %v1663_v36 }
 0xd5c   :  { %1657 = vmatmul.msk.f32.gmra.mxu3 %vm390_vm11, %v1219_v55 }
 0xd61   :  { %v1919_v29 = vpop.eup %1918 }
 0xd62   :  { %v1203_v48 = vpop.xlane.xlu0 %1202  ;;  %v1220_v61 = vmul.f32 %v1919_v29, %v1903_v17 }
 0xd63   :  { %1920 = vrcp.f32 %v1203_v48  ;;  %1840 = vrot.lane.b32.xlu0 %v1839_v39, %s1948_s27  ;;  %v1684_v48 = vld [vmem:[%s2601_s5 + $0xf8] sm:$0xff] }
 0xd64   :  { %1658 = vmatmul.msk.f32.gmra.mxu3 %vm390_vm11, %v1220_v61  ;;  %v1683_v61 = vld [vmem:[%s2601_s5 + $0xf0] sm:$0xff] }
 0xd69   :  { %v1921_v6 = vpop.eup %1920 }
 0xd6a   :  { %v1206_v8 = vpop.xlane.xlu2 %1205  ;;  %v1221_v44 = vmul.f32 %v1921_v6, %v1905_v30  ;;  %v1682_v6 = vld [vmem:[%s2601_s5 + $0xe8] sm:$0xff] }
 0xd6b   :  { %1922 = vrcp.f32 %v1206_v8 }
 0xd6c   :  { %1659 = vmatmul.msk.f32.gmra.mxu3 %vm390_vm11, %v1221_v44 }
 0xd71   :  { %v1923_v49 = vpop.eup %1922 }
 0xd72   :  { %v1222_v51 = vmul.f32 %v1923_v49, %v1907_v20  ;;  %v1836_v39 = vpop.permute.xlu2 %1835  ;;  %v1681_v49 = vld [vmem:[%s2601_s5 + $0xe0] sm:$0xff] }
 0xd73   :  { %v1837_v63 = vunpack.i.l.bf16 %v1836_v39  ;;  %v1838_v0 = vunpack.i.h.bf16 %v1836_v39 }
 0xd74   :  { %1660 = vmatmul.msk.f32.gmra.mxu3 %vm390_vm11, %v1222_v51 }
 0xd75   :  { %1380 = vmatpush.msrb.mxu1 %v1837_v63 }
 0xd77   :  { %1381 = vmatpush.msrb.mxu1 %v1838_v0  ;;  %v1437_v0 = vperm.slane %v2362_v3, 1 }
 0xdc2   :  { %v1185_v52 = vpop.xlane.xlu0 %1184 }
 0xdc3   :  { %1924 = vrcp.f32 %v1185_v52 }
 0xdc7   :  { %v1291_v54 = vpop.f32.mrf.mxu3 }
 0xdc9   :  { %v1925_v56 = vpop.eup %1924 }
 0xdca   :  { %v1215_v62 = vmul.f32 %v1925_v56, %v1913_v24 }
 0xdcc   :  { %1653 = vmatmul.msk.f32.vlgmr.msrb.gmra.mxu0 %vm390_vm11, %v1215_v62 }
 0xdcf   :  { %v1294_v31 = vpop.f32.mrf.mxu3 }
 0xdd0   :  { %1314 = vrot.lane.b32.xlu1 %v1294_v31, %s1952_s12 }
 0xdd5   :  { %v1841_v12 = vpop.permute.xlu0 %1840 }
 0xdd6   :  { %v1842_v14 = vunpack.i.l.bf16 %v1841_v12  ;;  %v1843_v16 = vunpack.i.h.bf16 %v1841_v12 }
 0xdd7   :  { %v1297_v38 = vpop.f32.mrf.mxu3 }
 0xdd8   :  { %1316 = vrot.lane.b32.xlu1 %v1297_v38, %s1952_s12  ;;  %1382 = vmatpush.msrb.mxu1 %v1842_v14 }
 0xdda   :  { %1383 = vmatpush.msrb.mxu1 %v1843_v16 }
 0xddc   :  { %1514 = vmatpush.msra.mxu1 %v1684_v48 }
 0xdde   :  { %1515 = vmatpush.msra.mxu1 %v1683_v61 }
 0xddf   :  { %v1300_v57 = vpop.f32.mrf.mxu3 }
 0xde0   :  { %1322 = vrot.lane.b32.xlu2 %v1300_v57, %s1947_s26  ;;  %1359 = vrot.lane.b32.xlu1 %v2365_v4, %s1948_s27 }
 0xde1   :  { %1516 = vmatpush.msra.mxu1 %v1682_v6  ;;  %v1513_v6 = vperm.slane %v2362_v3, 4 }
 0xde3   :  { %1517 = vmatpush.msra.mxu1 %v1681_v49 }
 0xde7   :  { %v1303_v5 = vpop.f32.mrf.mxu3 }
 0xde8   :  { %1324 = vrot.lane.b32.xlu2 %v1303_v5, %s1947_s26 }
 0xdef   :  { %v1306_v9 = vpop.f32.mrf.mxu3 }
 0xdf0   :  { %1330 = vrot.lane.b32.xlu0 %v1306_v9, %s1953_s13 }
 0xdf7   :  { %v1309_v11 = vpop.f32.mrf.mxu3 }
 0xdf8   :  { %1332 = vrot.lane.b32.xlu0 %v1309_v11, %s1953_s13  ;;  %v1440_v11 = vperm.slane %v2362_v3, 2 }
 0xe3a   :  { %v1323_v19 = vpop.permute.xlu2 %1322 }
 0xe42   :  { %v1315_v15 = vpop.permute.xlu1 %1314  ;;  %v1325_v32 = vpop.permute.xlu2 %1324 }
 0xe49   :  { %v1288_v17 = vpop.f32.mrf.mxu0 }
 0xe4a   :  { %v1336_v27 = vsel %vm316_vm10, %v1288_v17, %v1315_v15  ;;  %v1317_v30 = vpop.permute.xlu1 %1316 }
 0xe4b   :  { %v1338_v28 = vsel %vm311_vm8, %v1336_v27, %v1323_v19  ;;  %v1337_v53 = vsel %vm316_vm10, %v1291_v54, %v1317_v30  ;;  %v1679_v30 = vld [vmem:[%s2601_s5 + $0xd0] sm:$0xff] }
 0xe4c   :  { %v1339_v33 = vsel %vm311_vm8, %v1337_v53, %v1325_v32  ;;  %v1678_v53 = vld [vmem:[%s2601_s5 + $0xc8] sm:$0xff]  ;;  %v1677_v32 = vld [vmem:[%s2601_s5 + $0xc0] sm:$0xff] }
 0xe52   :  { %v1360_v23 = vpop.permute.xlu1 %1359 }
 0xe62   :  { %v1331_v4 = vpop.permute.xlu0 %1330 }
 0xe63   :  { %v1340_v47 = vsel %vm596_vm12, %v1338_v28, %v1331_v4 }
 0xe64   :  { %1661 = vmatmul.msk.f32.vlgmr.msrb.gmra.mxu1 %vm40_vm0, %v1340_v47  ;;  %v1680_v47 = vld [vmem:[%s2601_s5 + $0xd8] sm:$0xff] }
 0xe65   :  { %1518 = vmatpush.msra.mxu1 %v1680_v47 }
 0xe67   :  { %1519 = vmatpush.msra.mxu1 %v1679_v30 }
 0xe69   :  { %1520 = vmatpush.msra.mxu1 %v1678_v53 }
 0xe6a   :  { %v1333_v20 = vpop.permute.xlu0 %1332 }
 0xe6b   :  { %v1341_v37 = vsel %vm596_vm12, %v1339_v33, %v1333_v20  ;;  %1521 = vmatpush.msra.mxu1 %v1677_v32  ;;  %v1676_v20 = vld [vmem:[%s2601_s5 + $0xb8] sm:$0xff]  ;;  %v1675_v33 = vld [vmem:[%s2601_s5 + $0xb0] sm:$0xff] }
 0xe6c   :  { %1662 = vmatmul.msk.f32.gmra.mxu1 %vm40_vm0, %v1341_v37  ;;  %v1674_v37 = vld [vmem:[%s2601_s5 + $0xa8] sm:$0xff] }
 0xe6d   :  { %1522 = vmatpush.msra.mxu1 %v1676_v20 }
 0xe6f   :  { %1523 = vmatpush.msra.mxu1 %v1675_v33 }
 0xe71   :  { %1524 = vmatpush.msra.mxu1 %v1674_v37 }
 0xee1   :  { %v1385_v41 = vpop.f32.mrf.mxu1 }
 0xee2   :  { %v1386_v42 = vadd.f32 %v1385_v41, %v1360_v23  ;;  %v1672_v41 = vld [vmem:[%s2601_s5 + $0x98] sm:$0xff] }
 0xee4   :  { %v1391_v2 = vadd.f32 %v1386_v42, %v2351_v59  ;;  %v1671_v42 = vld [vmem:[%s2601_s5 + $0x90] sm:$0xff] }
 0xee6   :  { %v1393_v35 = vsel %vm40_vm0, %v1391_v2, 0.0 }
 0xee7   :  { %1394 = vadd.xlane.f32.xlu2 %v1393_v35  ;;  %v1669_v35 = vld [vmem:[%s2601_s5 + $0x80] sm:$0xff] }
 0xee9   :  { %v1388_v40 = vpop.f32.mrf.mxu1 }
 0xeea   :  { %v1389_v45 = vadd.f32 %v1388_v40, %v1360_v23  ;;  %v1673_v23 = vld [vmem:[%s2601_s5 + $0xa0] sm:$0xff]  ;;  %v1448_v40 = vperm.slane %v2362_v3, 3 }
 0xeeb   :  { %1525 = vmatpush.msra.mxu1 %v1673_v23 }
 0xeec   :  { %v1392_v46 = vadd.f32 %v1389_v45, %v2355_v1 }
 0xeed   :  { %1526 = vmatpush.msra.mxu1 %v1672_v41 }
 0xeee   :  { %v1396_v34 = vsel %vm40_vm0, %v1392_v46, 0.0 }
 0xeef   :  { %1397 = vadd.xlane.f32.xlu0 %v1396_v34  ;;  %1527 = vmatpush.msra.mxu1 %v1671_v42 }
 0xf5a   :  { %v1395_v59 = vpop.xlane.xlu2 %1394 }
 0xf5b   :  { %v1399_v22 = vmul.f32 %v1395_v59, %v2007_v10 }
 0xf5d   :  { %v1401_v13 = vsub.f32 %v1391_v2, %v1399_v22  ;;  %v1670_v2 = vld [vmem:[%s2601_s5 + $0x88] sm:$0xff] }
 0xf5e   :  { %1528 = vmatpush.msra.mxu1 %v1670_v2 }
 0xf5f   :  { %v1403_v25 = vmul.f32 %v1401_v13, %v1401_v13 }
 0xf60   :  { %1529 = vmatpush.msra.mxu1 %v1669_v35 }
 0xf61   :  { %v1405_v1 = vsel %vm40_vm0, %v1403_v25, 0.0 }
 0xf62   :  { %v1398_v50 = vpop.xlane.xlu0 %1397  ;;  %1406 = vadd.xlane.f32.xlu1 %v1405_v1 }
 0xf63   :  { %v1400_v24 = vmul.f32 %v1398_v50, %v2007_v10 }
 0xf65   :  { %v1402_v26 = vsub.f32 %v1392_v46, %v1400_v24 }
 0xf67   :  { %v1404_v58 = vmul.f32 %v1402_v26, %v1402_v26 }
 0xf69   :  { %v1408_v18 = vsel %vm40_vm0, %v1404_v58, 0.0 }
 0xf6a   :  { %1409 = vadd.xlane.f32.xlu2 %v1408_v18 }
 0xfd5   :  { %v1407_v60 = vpop.xlane.xlu1 %1406 }
 0xfd6   :  { %v1411_v55 = vmul.f32 %v1407_v60, %v2007_v10 }
 0xfd8   :  { %v1413_v29 = vadd.f32 1e-12, %v1411_v55 }
 0xfda   :  { %1926 = vrsqrt.f32 %v1413_v29  ;;  %vm1421_vm9 = vweird.f32 %v1413_v29 }
 0xfdd   :  { %v1410_v8 = vpop.xlane.xlu2 %1409 }
 0xfde   :  { %v1412_v44 = vmul.f32 %v1410_v8, %v2007_v10 }
 0xfe0   :  { %v1927_v51 = vpop.eup %1926  ;;  %v1414_v52 = vadd.f32 1e-12, %v1412_v44 }
 0xfe1   :  { %v1416_v54 = vmul.f32 %v1927_v51, %v1413_v29  ;;  %vm1422_vm8 = vweird.f32 %v1927_v51 }
 0xfe2   :  { %1928 = vrsqrt.f32 %v1414_v52  ;;  %vm1423_vm10 = vmor %vm1421_vm9, %vm1422_vm8  ;;  %vm1431_vm12 = vweird.f32 %v1414_v52 }
 0xfe3   :  { %v1417_v56 = vmul.f32 %v1927_v51, %v1416_v54 }
 0xfe5   :  { %v1418_v62 = vmul.f32 0.5, %v1417_v56 }
 0xfe7   :  { %v1419_v31 = vsub.f32 1.5, %v1418_v62 }
 0xfe8   :  { %v1929_v38 = vpop.eup %1928 }
 0xfe9   :  { %v1420_v39 = vmul.f32 %v1927_v51, %v1419_v31  ;;  %v1426_v63 = vmul.f32 %v1929_v38, %v1414_v52  ;;  %vm1432_vm11 = vweird.f32 %v1929_v38 }
 0xfea   :  { %vm1433_vm15 = vmor %vm1431_vm12, %vm1432_vm11 }
 0xfeb   :  { %v1424_v57 = vsel %vm1423_vm10, %v1927_v51, %v1420_v39  ;;  %v1427_v5 = vmul.f32 %v1929_v38, %v1426_v63 }
 0xfec   :  { %v1435_v9 = vmul.f32 %v1424_v57, %v1401_v13 }
 0xfed   :  { %v1428_v12 = vmul.f32 0.5, %v1427_v5 }
 0xfee   :  { %v1438_v14 = vmul.f32 %v1437_v0, %v1435_v9 }
 0xfef   :  { %v1429_v16 = vsub.f32 1.5, %v1428_v12 }
 0xff0   :  { %v2531_v15 = vadd.f32 %v1440_v11, %v1438_v14 }
 0xff1   :  { %v1430_v17 = vmul.f32 %v1929_v38, %v1429_v16 }
 0xff2   :  { %1667 = vmatmul.msk.f32.vlgmr.msra.gmra.mxu2 %vm40_vm0, %v2531_v15 }
 0xff3   :  { %v1434_v19 = vsel %vm1433_vm15, %v1929_v38, %v1430_v17  ;;  %v1939_v17 = vld [vmem:[%s2597_s7] sm:$0xf] }
 0xff4   :  { %v1436_v27 = vmul.f32 %v1434_v19, %v1402_v26  ;;  %v1594_v19 = vperm.slane %v1939_v17, 2 }
 0xff6   :  { %v1439_v4 = vmul.f32 %v1437_v0, %v1436_v27 }
 0xff8   :  { %v1442_v28 = vadd.f32 %v1440_v11, %v1439_v4 }
 0xffa   :  { %1668 = vmatmul.msk.f32.gmra.mxu2 %vm40_vm0, %v1442_v28 }
0x1075   :  { %v1472_v45 = vpop.f32.mrf.mxu2 }
0x1076   :  { %v1473_v46 = vadd.f32 %v1472_v45, %v1448_v40  ;;  %v1583_v45 = vperm.slane %v2362_v3, 5 }
0x1078   :  { %v1480_v34 = vmul.f32 0.044715, %v1473_v46  ;;  %v1478_v43 = vmul.f32 0.5, %v1473_v46 }
0x107a   :  { %v1482_v21 = vmul.f32 %v1480_v34, %v1473_v46 }
0x107c   :  { %v1484_v7 = vmul.f32 %v1482_v21, %v1473_v46 }
0x107d   :  { %v1475_v59 = vpop.f32.mrf.mxu2 }
0x107e   :  { %v1476_v22 = vadd.f32 %v1475_v59, %v1448_v40  ;;  %v1486_v13 = vadd.f32 %v1484_v7, %v1473_v46  ;;  %v1586_v59 = vperm.slane %v2362_v3, 6 }
0x1080   :  { %v1488_v25 = vmul.f32 0.7978846, %v1486_v13  ;;  %v1481_v1 = vmul.f32 0.044715, %v1476_v22  ;;  %v1479_v29 = vmul.f32 0.5, %v1476_v22 }
0x1082   :  { %1930 = vtanh.f32 %v1488_v25  ;;  %v1483_v50 = vmul.f32 %v1481_v1, %v1476_v22 }
0x1084   :  { %v1485_v24 = vmul.f32 %v1483_v50, %v1476_v22 }
0x1086   :  { %v1487_v26 = vadd.f32 %v1485_v24, %v1476_v22 }
0x1088   :  { %v1931_v58 = vpop.eup %1930  ;;  %v1489_v18 = vmul.f32 0.7978846, %v1487_v26  ;;  %v1600_v26 = vld [vmem:[%s2602_s2] sm:$0x3] }
0x1089   :  { %v1492_v36 = vadd.f32 1.0, %v1931_v58 }
0x108a   :  { %1932 = vtanh.f32 %v1489_v18 }
0x108b   :  { %v1494_v60 = vmul.f32 %v1492_v36, %v1478_v43  ;;  %v1608_v43 = vperm.slane %v1939_v17, 3 }
0x108d   :  { %1530 = vmatmul.f32.vlgmr.msra.gmra.mxu1 %v1494_v60 }
0x1090   :  { %v1933_v55 = vpop.eup %1932 }
0x1091   :  { %v1493_v48 = vadd.f32 1.0, %v1933_v55 }
0x1093   :  { %v1495_v61 = vmul.f32 %v1493_v48, %v1479_v29 }
0x1095   :  { %1533 = vmatmul.f32.gmra.mxu1 %v1495_v61 }
0x110a   :  { %v1531_v8 = vpop.f32.mrf.mxu1 }
0x110b   :  { %v1532_v44 = vadd.f32 %v1531_v8, %v1513_v6 }
0x110d   :  { %v1537_v49 = vadd.f32 %v1532_v44, %v2531_v15 }
0x110f   :  { %v1539_v51 = vsel %vm40_vm0, %v1537_v49, 0.0 }
0x1110   :  { %1540 = vadd.xlane.f32.xlu1 %v1539_v51 }
0x1112   :  { %v1534_v52 = vpop.f32.mrf.mxu1 }
0x1113   :  { %v1535_v54 = vadd.f32 %v1534_v52, %v1513_v6 }
0x1115   :  { %v1538_v56 = vadd.f32 %v1535_v54, %v1442_v28 }
0x1117   :  { %v1542_v62 = vsel %vm40_vm0, %v1538_v56, 0.0 }
0x1118   :  { %1543 = vadd.xlane.f32.xlu0 %v1542_v62 }
0x1183   :  { %v1541_v31 = vpop.xlane.xlu1 %1540 }
0x1184   :  { %v1545_v38 = vmul.f32 %v1541_v31, %v2007_v10 }
0x1186   :  { %v1547_v39 = vsub.f32 %v1537_v49, %v1545_v38 }
0x1188   :  { %v1549_v63 = vmul.f32 %v1547_v39, %v1547_v39 }
0x118a   :  { %v1551_v0 = vsel %vm40_vm0, %v1549_v63, 0.0 }
0x118b   :  { %1552 = vadd.xlane.f32.xlu0 %v1551_v0  ;;  %v1544_v57 = vpop.xlane.xlu0 %1543 }
0x118c   :  { %v1546_v5 = vmul.f32 %v1544_v57, %v2007_v10 }
0x118e   :  { %v1548_v9 = vsub.f32 %v1538_v56, %v1546_v5 }
0x1190   :  { %v1550_v11 = vmul.f32 %v1548_v9, %v1548_v9 }
0x1192   :  { %v1554_v12 = vsel %vm40_vm0, %v1550_v11, 0.0 }
0x1193   :  { %1555 = vadd.xlane.f32.xlu2 %v1554_v12 }
0x11ab   :  { %1602 = vrot.lane.b32.xlu2 %v1594_v19, %s1941_s20 }
0x11fe   :  { %v1553_v14 = vpop.xlane.xlu0 %1552 }
0x11ff   :  { %v1557_v16 = vmul.f32 %v1553_v14, %v2007_v10 }
0x1201   :  { %v1559_v15 = vadd.f32 1e-12, %v1557_v16 }
0x1203   :  { %1934 = vrsqrt.f32 %v1559_v15  ;;  %vm1567_vm1 = vweird.f32 %v1559_v15 }
0x1206   :  { %v1556_v27 = vpop.xlane.xlu2 %1555 }
0x1207   :  { %v1558_v4 = vmul.f32 %v1556_v27, %v2007_v10 }
0x1209   :  { %v1935_v28 = vpop.eup %1934  ;;  %v1560_v47 = vadd.f32 1e-12, %v1558_v4 }
0x120a   :  { %v1562_v30 = vmul.f32 %v1935_v28, %v1559_v15  ;;  %vm1568_vm0 = vweird.f32 %v1935_v28 }
0x120b   :  { %1936 = vrsqrt.f32 %v1560_v47  ;;  %vm1569_vm2 = vmor %vm1567_vm1, %vm1568_vm0  ;;  %vm1577_vm4 = vweird.f32 %v1560_v47 }
0x120c   :  { %v1563_v53 = vmul.f32 %v1935_v28, %v1562_v30 }
0x120e   :  { %v1564_v32 = vmul.f32 0.5, %v1563_v53  ;;  %v1603_v58 = vpop.permute.xlu2 %1602 }
0x120f   :  { %v1605_v18 = vmul.f32 %v1603_v58, %v1600_v26 }
0x1210   :  { %v1565_v20 = vsub.f32 1.5, %v1564_v32 }
0x1211   :  { %v1937_v33 = vpop.eup %1936 }
0x1212   :  { %v1572_v37 = vmul.f32 %v1937_v33, %v1560_v47  ;;  %v1566_v23 = vmul.f32 %v1935_v28, %v1565_v20  ;;  %vm1578_vm3 = vweird.f32 %v1937_v33 }
0x1213   :  { %vm1579_vm5 = vmor %vm1577_vm4, %vm1578_vm3 }
0x1214   :  { %v1573_v41 = vmul.f32 %v1937_v33, %v1572_v37  ;;  %v1570_v2 = vsel %vm1569_vm2, %v1935_v28, %v1566_v23 }
0x1215   :  { %v1581_v40 = vmul.f32 %v1570_v2, %v1547_v39 }
0x1216   :  { %v1574_v42 = vmul.f32 0.5, %v1573_v41 }
0x1217   :  { %v1584_v21 = vmul.f32 %v1583_v45, %v1581_v40 }
0x1218   :  { %v1575_v35 = vsub.f32 1.5, %v1574_v42 }
0x1219   :  { %v1587_v13 = vadd.f32 %v1586_v59, %v1584_v21 }
0x121a   :  { %v1576_v10 = vmul.f32 %v1937_v33, %v1575_v35 }
0x121c   :  { %v1580_v46 = vsel %vm1579_vm5, %v1937_v33, %v1576_v10 }
0x121d   :  { %v1582_v34 = vmul.f32 %v1580_v46, %v1548_v9 }
0x121f   :  { %v1585_v7 = vmul.f32 %v1583_v45, %v1582_v34 }
0x1221   :  { %v1588_v22 = vadd.f32 %v1586_v59, %v1585_v7 }
0x1223   :  { %v1590_v25 = vrot.slane %v1588_v22, 7 }
0x1225   :  { %v1593_v1 = vsel %vm1592_vm6, %v1587_v13, %v1590_v25 }
0x1226   :  { %v1595_v50 = vmul.f32 %v1594_v19, %v1593_v1 }
0x1228   :  { %v1597_v24 = vsel %vm1596_vm7, %v1595_v50, 0.0 }
0x1229   :  { %1598 = vadd.xlane.f32.xlu1 %v1597_v24 }
0x129c   :  { %v1599_v36 = vpop.xlane.xlu1 %1598 }
0x129d   :  { %v1607_v60 = vadd.f32 %v1605_v18, %v1599_v36 }
0x129f   :  { %v1609_v3 = vadd.f32 %v1608_v43, %v1607_v60 }
0x12a1   :  { %1611 = vst.msk [vmem:[%s2603_s8] sm:$0x3] %vm1610_vm13, %v1609_v3 }

</bundles_post_ra>
